<compile_context>
chip_gen: v7x
topology: tpu7x:2x2x1
jax: 0.10.0
libtpu: 0.0.40
codegen_flags: <defaults>
</compile_context>

<pallas_src>
import functools

import jax
import jax.numpy as jnp
import numpy as np
from jax import lax
from jax.experimental import pallas as pl
from jax.experimental.pallas import tpu as pltpu

_LN_EPS = 1e-5


def _layernorm(x2d, g, b):
    mu = jnp.mean(x2d, axis=-1, keepdims=True)
    xc = x2d - mu
    var = jnp.mean(xc * xc, axis=-1, keepdims=True)
    return xc * lax.rsqrt(var + _LN_EPS) * g + b


def _erf(x):
    # Abramowitz & Stegun 7.1.26 rational approximation, |error| < 1.5e-7.
    p = 0.3275911
    a1, a2, a3, a4, a5 = (0.254829592, -0.284496736, 1.421413741,
                          -1.453152027, 1.061405429)
    ax = jnp.abs(x)
    t = 1.0 / (1.0 + p * ax)
    poly = t * (a1 + t * (a2 + t * (a3 + t * (a4 + t * a5))))
    y = 1.0 - poly * jnp.exp(-ax * ax)
    return jnp.where(x < 0, -y, y)


def _gelu_exact(x):
    return 0.5 * x * (1.0 + _erf(x * 0.7071067811865476))


def _transformer_kernel(x_ref,
                        ln1_g_ref, ln1_b_ref, wqkv_ref, wo_ref, bo_ref,
                        ln2_g_ref, ln2_b_ref, w1_ref, b1_ref, w2_ref, b2_ref,
                        lnf_g_ref, lnf_b_ref,
                        o_ref, *, depth, heads, dim_head):
    N, D = x_ref.shape[1], x_ref.shape[2]
    inner = heads * dim_head
    bf16, f32 = jnp.bfloat16, jnp.float32

    x = x_ref[0].astype(f32)                       # (N, D): one batch element / grid step

    for l in range(depth):                          # depth=2: static unroll is fine here
        # ------------- Attention block (pre-norm, residual) -------------
        xn = _layernorm(x, ln1_g_ref[l], ln1_b_ref[l])                     # (N, D) f32
        # Fused QKV projection; softmax scale already folded into the Q columns.
        qkv = jnp.dot(xn.astype(bf16), wqkv_ref[l],
                      preferred_element_type=f32)                          # (N, 3*inner)

        attn_out = jnp.zeros((N, D), f32)
        for h in range(heads):
            q = qkv[:, h * dim_head:(h + 1) * dim_head]                    # (N, dh)
            k = qkv[:, inner + h * dim_head:inner + (h + 1) * dim_head]
            v = qkv[:, 2 * inner + h * dim_head:2 * inner + (h + 1) * dim_head]

            dots = jnp.einsum('nd,md->nm', q.astype(bf16), k.astype(bf16),
                              preferred_element_type=f32)                  # (N, N)
            m = jnp.max(dots, axis=-1, keepdims=True)
            e = jnp.exp(dots - m)
            p = e * pl.reciprocal(jnp.sum(e, axis=-1, keepdims=True), approx=True)

            o_h = jnp.dot(p.astype(bf16), v.astype(bf16),
                          preferred_element_type=f32)                      # (N, dh)
            # sum_h o_h @ Wo_h  ==  concat_h(o_h) @ Wo   (the to_out projection)
            attn_out = attn_out + jnp.dot(o_h.astype(bf16), wo_ref[l, h],
                                          preferred_element_type=f32)

        x = x + attn_out + bo_ref[l]

        # ------------- FeedForward block (pre-norm, residual) -------------
        xn = _layernorm(x, ln2_g_ref[l], ln2_b_ref[l])
        h1 = jnp.dot(xn.astype(bf16), w1_ref[l], preferred_element_type=f32) + b1_ref[l]
        h1 = _gelu_exact(h1)
        x = x + jnp.dot(h1.astype(bf16), w2_ref[l], preferred_element_type=f32) + b2_ref[l]

    o_ref[0] = _layernorm(x, lnf_g_ref[...], lnf_b_ref[...]).astype(o_ref.dtype)


def _full_block(arr):
    """Whole-array VMEM block whose index never changes across the batch grid."""
    nd = arr.ndim
    return pl.BlockSpec(arr.shape, lambda b, _nd=nd: (0,) * _nd)


def transformer_forward(x, params, *, depth, heads, dim_head):
    """x: (B, N, dim) float32 params mirror the PyTorch module. Returns (B, N, dim)."""
    B, N, D = x.shape
    inner = heads * dim_head
    scale = dim_head ** -0.5

    # --- host-side packing: fold softmax scale into Wq, cast matmul weights to bf16 ---
    wqkv = params['wqkv'].at[:, :, :inner].multiply(scale).astype(jnp.bfloat16)
    wo = params['wo'].reshape(depth, heads, dim_head, D).astype(jnp.bfloat16)
    w1 = params['w1'].astype(jnp.bfloat16)
    w2 = params['w2'].astype(jnp.bfloat16)

    kernel = functools.partial(_transformer_kernel, depth=depth, heads=heads,
                               dim_head=dim_head)

    kernel_args = (x,
                   params['ln1_g'], params['ln1_b'], wqkv, wo, params['bo'],
                   params['ln2_g'], params['ln2_b'], w1, params['b1'],
                   w2, params['b2'],
                   params['lnf_g'], params['lnf_b'])

    in_specs = ([pl.BlockSpec((1, N, D), lambda b: (b, 0, 0))]
                + [_full_block(a) for a in kernel_args[1:]])

    return pl.pallas_call(
        kernel,
        grid=(B,),
        in_specs=in_specs,
        out_specs=pl.BlockSpec((1, N, D), lambda b: (b, 0, 0)),
        out_shape=jax.ShapeDtypeStruct((B, N, D), x.dtype),
        compiler_params=pltpu.CompilerParams(
            dimension_semantics=("parallel",),          # shards batch across TCs on v7x
            vmem_limit_bytes=32 * 1024 * 1024),
    )(*kernel_args)


def _reference(x, params, *, depth, heads, dim_head):
    """Pure-JAX f32 reference mirroring the PyTorch module (eval mode)."""
    HIGH = lax.Precision.HIGHEST
    scale = dim_head ** -0.5
    inner = heads * dim_head
    B, N, D = x.shape

    def ln(t, g, b):
        mu = t.mean(-1, keepdims=True)
        var = ((t - mu) ** 2).mean(-1, keepdims=True)
        return (t - mu) / jnp.sqrt(var + _LN_EPS) * g + b

    for l in range(depth):
        xn = ln(x, params['ln1_g'][l], params['ln1_b'][l])
        qkv = jnp.einsum('bnd,de->bne', xn, params['wqkv'][l], precision=HIGH)
        q, k, v = jnp.split(qkv, 3, axis=-1)                      # chunk(3, dim=-1)
        q = q.reshape(B, N, heads, dim_head).transpose(0, 2, 1, 3)  # b n (h d) -> b h n d
        k = k.reshape(B, N, heads, dim_head).transpose(0, 2, 1, 3)
        v = v.reshape(B, N, heads, dim_head).transpose(0, 2, 1, 3)
        dots = jnp.einsum('bhne,bhme->bhnm', q, k, precision=HIGH) * scale
        attn = jax.nn.softmax(dots, axis=-1)
        o = jnp.einsum('bhnm,bhme->bhne', attn, v, precision=HIGH)
        o = o.transpose(0, 2, 1, 3).reshape(B, N, inner)            # b h n d -> b n (h d)
        x = x + jnp.einsum('bne,ed->bnd', o, params['wo'][l],
                           precision=HIGH) + params['bo'][l]
        xn = ln(x, params['ln2_g'][l], params['ln2_b'][l])
        h = jnp.einsum('bnm,mk->bnk', xn, params['w1'][l],
                       precision=HIGH) + params['b1'][l]
        h = jax.nn.gelu(h, approximate=False)                       # exact erf GELU
        x = x + jnp.einsum('bnk,kd->bnd', h, params['w2'][l],
                           precision=HIGH) + params['b2'][l]
    return ln(x, params['lnf_g'], params['lnf_b'])


if __name__ == "__main__":
    # Small shapes consistent with the module: batch=2, seq=8, dim=32,
    # depth=2, heads=4, dim_head=8 (inner_dim=32 -> project_out=True), mlp_dim=64.
    B, N_SEQ = 2, 8
    DIM, DEPTH, HEADS, DIM_HEAD, MLP_DIM = 32, 2, 4, 8, 64
    INNER = HEADS * DIM_HEAD

    key = jax.random.PRNGKey(0)
    kit = iter(jax.random.split(key, 20))
    nk = lambda: next(kit)
    # Matmul weights are made bf16-representable so the kernel's bf16 weights and the
    # f32 reference weights are numerically identical values.
    bf16r = lambda a: a.astype(jnp.bfloat16).astype(jnp.float32)

    x = jax.random.normal(nk(), (B, N_SEQ, DIM), jnp.float32)

    params = dict(
        ln1_g=1.0 + 0.1 * jax.random.normal(nk(), (DEPTH, 1, DIM), jnp.float32),
        ln1_b=0.1 * jax.random.normal(nk(), (DEPTH, 1, DIM), jnp.float32),
        # to_qkv: single Linear(dim, 3*inner, bias=False); columns = [q | k | v],
        # each chunk head-major (h d) — exactly the PyTorch layout.
        wqkv=bf16r(jax.random.normal(nk(), (DEPTH, DIM, 3 * INNER), jnp.float32) * DIM ** -0.5),
        wo=bf16r(jax.random.normal(nk(), (DEPTH, INNER, DIM), jnp.float32) * INNER ** -0.5),
        bo=0.1 * jax.random.normal(nk(), (DEPTH, 1, DIM), jnp.float32),
        ln2_g=1.0 + 0.1 * jax.random.normal(nk(), (DEPTH, 1, DIM), jnp.float32),
        ln2_b=0.1 * jax.random.normal(nk(), (DEPTH, 1, DIM), jnp.float32),
        w1=bf16r(jax.random.normal(nk(), (DEPTH, DIM, MLP_DIM), jnp.float32) * DIM ** -0.5),
        b1=0.1 * jax.random.normal(nk(), (DEPTH, 1, MLP_DIM), jnp.float32),
        w2=bf16r(jax.random.normal(nk(), (DEPTH, MLP_DIM, DIM), jnp.float32) * MLP_DIM ** -0.5),
        b2=0.1 * jax.random.normal(nk(), (DEPTH, 1, DIM), jnp.float32),
        lnf_g=1.0 + 0.1 * jax.random.normal(nk(), (1, DIM), jnp.float32),
        lnf_b=0.1 * jax.random.normal(nk(), (1, DIM), jnp.float32),
    )

    out = transformer_forward(x, params, depth=DEPTH, heads=HEADS, dim_head=DIM_HEAD)
    out = jax.block_until_ready(out)

    ref = _reference(x, params, depth=DEPTH, heads=HEADS, dim_head=DIM_HEAD)
    ref = jax.block_until_ready(ref)

    assert out.shape == (B, N_SEQ, DIM)
    # Tolerance reflects bf16 MXU inputs (per perf review) vs. the f32 HIGHEST-precision
    # reference; a structural/semantic bug would be off by O(1) on these LN'd outputs.
    np.testing.assert_allclose(np.asarray(out), np.asarray(ref), rtol=4e-2, atol=4e-2)
    print("KERNEL_OK")
</pallas_src>

<mosaic_0001>
module attributes {stable_mosaic.version = 11 : i64} {
  func.func @_transformer_kernel(%arg0: i32, %arg1: memref<1x8x32xf32, #tpu.memory_space<vmem>>, %arg2: memref<2x1x32xf32, #tpu.memory_space<vmem>>, %arg3: memref<2x1x32xf32, #tpu.memory_space<vmem>>, %arg4: memref<2x32x96xbf16, #tpu.memory_space<vmem>>, %arg5: memref<2x4x8x32xbf16, #tpu.memory_space<vmem>>, %arg6: memref<2x1x32xf32, #tpu.memory_space<vmem>>, %arg7: memref<2x1x32xf32, #tpu.memory_space<vmem>>, %arg8: memref<2x1x32xf32, #tpu.memory_space<vmem>>, %arg9: memref<2x32x64xbf16, #tpu.memory_space<vmem>>, %arg10: memref<2x1x64xf32, #tpu.memory_space<vmem>>, %arg11: memref<2x64x32xbf16, #tpu.memory_space<vmem>>, %arg12: memref<2x1x32xf32, #tpu.memory_space<vmem>>, %arg13: memref<1x32xf32, #tpu.memory_space<vmem>>, %arg14: memref<1x32xf32, #tpu.memory_space<vmem>>, %arg15: memref<1x8x32xf32, #tpu.memory_space<vmem>>) attributes {dimension_semantics = [#tpu.dimension_semantics<parallel>], iteration_bounds = array<i64: 2>, scalar_prefetch = 0 : i64, scratch_operands = 0 : i64, tpu.core_type = #tpu.core_type<tc>, window_params = [{transform_indices = @transform_0, window_bounds = array<i64: 1, 8, 32>}, {pipeline_mode = #tpu.pipeline_mode<synchronous>, transform_indices = @transform_1, window_bounds = array<i64: 2, 1, 32>}, {pipeline_mode = #tpu.pipeline_mode<synchronous>, transform_indices = @transform_2, window_bounds = array<i64: 2, 1, 32>}, {pipeline_mode = #tpu.pipeline_mode<synchronous>, transform_indices = @transform_3, window_bounds = array<i64: 2, 32, 96>}, {pipeline_mode = #tpu.pipeline_mode<synchronous>, transform_indices = @transform_4, window_bounds = array<i64: 2, 4, 8, 32>}, {pipeline_mode = #tpu.pipeline_mode<synchronous>, transform_indices = @transform_5, window_bounds = array<i64: 2, 1, 32>}, {pipeline_mode = #tpu.pipeline_mode<synchronous>, transform_indices = @transform_6, window_bounds = array<i64: 2, 1, 32>}, {pipeline_mode = #tpu.pipeline_mode<synchronous>, transform_indices = @transform_7, window_bounds = array<i64: 2, 1, 32>}, {pipeline_mode = #tpu.pipeline_mode<synchronous>, transform_indices = @transform_8, window_bounds = array<i64: 2, 32, 64>}, {pipeline_mode = #tpu.pipeline_mode<synchronous>, transform_indices = @transform_9, window_bounds = array<i64: 2, 1, 64>}, {pipeline_mode = #tpu.pipeline_mode<synchronous>, transform_indices = @transform_10, window_bounds = array<i64: 2, 64, 32>}, {pipeline_mode = #tpu.pipeline_mode<synchronous>, transform_indices = @transform_11, window_bounds = array<i64: 2, 1, 32>}, {pipeline_mode = #tpu.pipeline_mode<synchronous>, transform_indices = @transform_12, window_bounds = array<i64: 1, 32>}, {pipeline_mode = #tpu.pipeline_mode<synchronous>, transform_indices = @transform_13, window_bounds = array<i64: 1, 32>}, {transform_indices = @transform_14, window_bounds = array<i64: 1, 8, 32>}]} {
    %c0 = arith.constant 0 : index
    %c0_0 = arith.constant 0 : index
    %c0_1 = arith.constant 0 : index
    %0 = vector.load %arg1[%c0, %c0_0, %c0_1] : memref<1x8x32xf32, #tpu.memory_space<vmem>>, vector<1x8x32xf32>
    %1 = vector.shape_cast %0 : vector<1x8x32xf32> to vector<8x32xf32>
    %c0_2 = arith.constant 0 : index
    %c0_3 = arith.constant 0 : index
    %c0_4 = arith.constant 0 : index
    %2 = vector.load %arg2[%c0_2, %c0_3, %c0_4] : memref<2x1x32xf32, #tpu.memory_space<vmem>>, vector<1x1x32xf32>
    %3 = vector.shape_cast %2 : vector<1x1x32xf32> to vector<1x32xf32>
    %c0_5 = arith.constant 0 : index
    %c0_6 = arith.constant 0 : index
    %c0_7 = arith.constant 0 : index
    %4 = vector.load %arg3[%c0_5, %c0_6, %c0_7] : memref<2x1x32xf32, #tpu.memory_space<vmem>>, vector<1x1x32xf32>
    %5 = vector.shape_cast %4 : vector<1x1x32xf32> to vector<1x32xf32>
    %cst = arith.constant dense<0.000000e+00> : vector<8xf32>
    %6 = vector.multi_reduction <add>, %1, %cst [1] : vector<8x32xf32> to vector<8xf32>
    %7 = vector.shape_cast %6 : vector<8xf32> to vector<8x1xf32>
    %cst_8 = arith.constant 3.200000e+01 : f32
    %8 = vector.broadcast %cst_8 : f32 to vector<8x1xf32>
    %9 = arith.divf %7, %8 : vector<8x1xf32>
    %10 = vector.broadcast %9 : vector<8x1xf32> to vector<8x32xf32>
    %11 = arith.subf %1, %10 : vector<8x32xf32>
    %12 = arith.mulf %11, %11 : vector<8x32xf32>
    %cst_9 = arith.constant dense<0.000000e+00> : vector<8xf32>
    %13 = vector.multi_reduction <add>, %12, %cst_9 [1] : vector<8x32xf32> to vector<8xf32>
    %14 = vector.shape_cast %13 : vector<8xf32> to vector<8x1xf32>
    %cst_10 = arith.constant 3.200000e+01 : f32
    %15 = vector.broadcast %cst_10 : f32 to vector<8x1xf32>
    %16 = arith.divf %14, %15 : vector<8x1xf32>
    %cst_11 = arith.constant 9.99999974E-6 : f32
    %17 = vector.broadcast %cst_11 : f32 to vector<8x1xf32>
    %18 = arith.addf %16, %17 : vector<8x1xf32>
    %19 = math.rsqrt %18 : vector<8x1xf32>
    %20 = vector.broadcast %19 : vector<8x1xf32> to vector<8x32xf32>
    %21 = arith.mulf %11, %20 : vector<8x32xf32>
    %22 = vector.broadcast %3 : vector<1x32xf32> to vector<8x32xf32>
    %23 = arith.mulf %21, %22 : vector<8x32xf32>
    %24 = vector.broadcast %5 : vector<1x32xf32> to vector<8x32xf32>
    %25 = arith.addf %23, %24 : vector<8x32xf32>
    %26 = arith.truncf %25 : vector<8x32xf32> to vector<8x32xbf16>
    %c0_12 = arith.constant 0 : index
    %c0_13 = arith.constant 0 : index
    %c0_14 = arith.constant 0 : index
    %27 = vector.load %arg4[%c0_12, %c0_13, %c0_14] : memref<2x32x96xbf16, #tpu.memory_space<vmem>>, vector<1x32x96xbf16>
    %28 = vector.shape_cast %27 : vector<1x32x96xbf16> to vector<32x96xbf16>
    %cst_15 = arith.constant dense<0.000000e+00> : vector<8x96xf32>
    %29 = tpu.matmul %26, %28, %cst_15 {dimension_numbers = #tpu.dot_dimension_numbers<[1], [0], [0], [1], [0, 0, 1, 1], [], []>} : vector<8x32xbf16>, vector<32x96xbf16>, vector<8x96xf32> -> vector<8x96xf32>
    %cst_16 = arith.constant 0.000000e+00 : f32
    %30 = vector.broadcast %cst_16 : f32 to vector<8x32xf32>
    %31 = vector.extract_strided_slice %29 {offsets = [0, 0], sizes = [8, 8], strides = [1, 1]} : vector<8x96xf32> to vector<8x8xf32>
    %32 = vector.extract_strided_slice %29 {offsets = [0, 32], sizes = [8, 8], strides = [1, 1]} : vector<8x96xf32> to vector<8x8xf32>
    %33 = vector.extract_strided_slice %29 {offsets = [0, 64], sizes = [8, 8], strides = [1, 1]} : vector<8x96xf32> to vector<8x8xf32>
    %34 = arith.truncf %31 : vector<8x8xf32> to vector<8x8xbf16>
    %35 = arith.truncf %32 : vector<8x8xf32> to vector<8x8xbf16>
    "tpu.trace_start"() <{level = 10 : i32, message = "nd,md->nm"}> : () -> ()
    %cst_17 = arith.constant dense<0.000000e+00> : vector<8x8xf32>
    %36 = tpu.matmul %34, %35, %cst_17 {dimension_numbers = #tpu.dot_dimension_numbers<[1], [1], [0], [0], [0, 0, 1, 0], [], []>} : vector<8x8xbf16>, vector<8x8xbf16>, vector<8x8xf32> -> vector<8x8xf32>
    "tpu.trace_stop"() : () -> ()
    %cst_18 = arith.constant dense<0xFF800000> : vector<8xf32>
    %37 = vector.multi_reduction <maximumf>, %36, %cst_18 [1] : vector<8x8xf32> to vector<8xf32>
    %38 = vector.shape_cast %37 : vector<8xf32> to vector<8x1xf32>
    %39 = vector.broadcast %38 : vector<8x1xf32> to vector<8x8xf32>
    %40 = arith.subf %36, %39 : vector<8x8xf32>
    %41 = math.exp %40 : vector<8x8xf32>
    %cst_19 = arith.constant dense<0.000000e+00> : vector<8xf32>
    %42 = vector.multi_reduction <add>, %41, %cst_19 [1] : vector<8x8xf32> to vector<8xf32>
    %43 = vector.shape_cast %42 : vector<8xf32> to vector<8x1xf32>
    %44 = tpu.reciprocal %43 {approx = true} : vector<8x1xf32> -> vector<8x1xf32>
    %45 = vector.broadcast %44 : vector<8x1xf32> to vector<8x8xf32>
    %46 = arith.mulf %41, %45 : vector<8x8xf32>
    %47 = arith.truncf %46 : vector<8x8xf32> to vector<8x8xbf16>
    %48 = arith.truncf %33 : vector<8x8xf32> to vector<8x8xbf16>
    %cst_20 = arith.constant dense<0.000000e+00> : vector<8x8xf32>
    %49 = tpu.matmul %47, %48, %cst_20 {dimension_numbers = #tpu.dot_dimension_numbers<[1], [0], [0], [1], [0, 0, 1, 1], [], []>} : vector<8x8xbf16>, vector<8x8xbf16>, vector<8x8xf32> -> vector<8x8xf32>
    %50 = arith.truncf %49 : vector<8x8xf32> to vector<8x8xbf16>
    %c0_21 = arith.constant 0 : index
    %c0_22 = arith.constant 0 : index
    %c0_23 = arith.constant 0 : index
    %c0_24 = arith.constant 0 : index
    %51 = vector.load %arg5[%c0_21, %c0_22, %c0_23, %c0_24] : memref<2x4x8x32xbf16, #tpu.memory_space<vmem>>, vector<1x1x8x32xbf16>
    %52 = vector.shape_cast %51 : vector<1x1x8x32xbf16> to vector<8x32xbf16>
    %cst_25 = arith.constant dense<0.000000e+00> : vector<8x32xf32>
    %53 = tpu.matmul %50, %52, %cst_25 {dimension_numbers = #tpu.dot_dimension_numbers<[1], [0], [0], [1], [0, 0, 1, 1], [], []>} : vector<8x8xbf16>, vector<8x32xbf16>, vector<8x32xf32> -> vector<8x32xf32>
    %54 = arith.addf %30, %53 : vector<8x32xf32>
    %55 = vector.extract_strided_slice %29 {offsets = [0, 8], sizes = [8, 8], strides = [1, 1]} : vector<8x96xf32> to vector<8x8xf32>
    %56 = vector.extract_strided_slice %29 {offsets = [0, 40], sizes = [8, 8], strides = [1, 1]} : vector<8x96xf32> to vector<8x8xf32>
    %57 = vector.extract_strided_slice %29 {offsets = [0, 72], sizes = [8, 8], strides = [1, 1]} : vector<8x96xf32> to vector<8x8xf32>
    %58 = arith.truncf %55 : vector<8x8xf32> to vector<8x8xbf16>
    %59 = arith.truncf %56 : vector<8x8xf32> to vector<8x8xbf16>
    "tpu.trace_start"() <{level = 10 : i32, message = "nd,md->nm"}> : () -> ()
    %cst_26 = arith.constant dense<0.000000e+00> : vector<8x8xf32>
    %60 = tpu.matmul %58, %59, %cst_26 {dimension_numbers = #tpu.dot_dimension_numbers<[1], [1], [0], [0], [0, 0, 1, 0], [], []>} : vector<8x8xbf16>, vector<8x8xbf16>, vector<8x8xf32> -> vector<8x8xf32>
    "tpu.trace_stop"() : () -> ()
    %cst_27 = arith.constant dense<0xFF800000> : vector<8xf32>
    %61 = vector.multi_reduction <maximumf>, %60, %cst_27 [1] : vector<8x8xf32> to vector<8xf32>
    %62 = vector.shape_cast %61 : vector<8xf32> to vector<8x1xf32>
    %63 = vector.broadcast %62 : vector<8x1xf32> to vector<8x8xf32>
    %64 = arith.subf %60, %63 : vector<8x8xf32>
    %65 = math.exp %64 : vector<8x8xf32>
    %cst_28 = arith.constant dense<0.000000e+00> : vector<8xf32>
    %66 = vector.multi_reduction <add>, %65, %cst_28 [1] : vector<8x8xf32> to vector<8xf32>
    %67 = vector.shape_cast %66 : vector<8xf32> to vector<8x1xf32>
    %68 = tpu.reciprocal %67 {approx = true} : vector<8x1xf32> -> vector<8x1xf32>
    %69 = vector.broadcast %68 : vector<8x1xf32> to vector<8x8xf32>
    %70 = arith.mulf %65, %69 : vector<8x8xf32>
    %71 = arith.truncf %70 : vector<8x8xf32> to vector<8x8xbf16>
    %72 = arith.truncf %57 : vector<8x8xf32> to vector<8x8xbf16>
    %cst_29 = arith.constant dense<0.000000e+00> : vector<8x8xf32>
    %73 = tpu.matmul %71, %72, %cst_29 {dimension_numbers = #tpu.dot_dimension_numbers<[1], [0], [0], [1], [0, 0, 1, 1], [], []>} : vector<8x8xbf16>, vector<8x8xbf16>, vector<8x8xf32> -> vector<8x8xf32>
    %74 = arith.truncf %73 : vector<8x8xf32> to vector<8x8xbf16>
    %c0_30 = arith.constant 0 : index
    %c1 = arith.constant 1 : index
    %c0_31 = arith.constant 0 : index
    %c0_32 = arith.constant 0 : index
    %75 = vector.load %arg5[%c0_30, %c1, %c0_31, %c0_32] : memref<2x4x8x32xbf16, #tpu.memory_space<vmem>>, vector<1x1x8x32xbf16>
    %76 = vector.shape_cast %75 : vector<1x1x8x32xbf16> to vector<8x32xbf16>
    %cst_33 = arith.constant dense<0.000000e+00> : vector<8x32xf32>
    %77 = tpu.matmul %74, %76, %cst_33 {dimension_numbers = #tpu.dot_dimension_numbers<[1], [0], [0], [1], [0, 0, 1, 1], [], []>} : vector<8x8xbf16>, vector<8x32xbf16>, vector<8x32xf32> -> vector<8x32xf32>
    %78 = arith.addf %54, %77 : vector<8x32xf32>
    %79 = vector.extract_strided_slice %29 {offsets = [0, 16], sizes = [8, 8], strides = [1, 1]} : vector<8x96xf32> to vector<8x8xf32>
    %80 = vector.extract_strided_slice %29 {offsets = [0, 48], sizes = [8, 8], strides = [1, 1]} : vector<8x96xf32> to vector<8x8xf32>
    %81 = vector.extract_strided_slice %29 {offsets = [0, 80], sizes = [8, 8], strides = [1, 1]} : vector<8x96xf32> to vector<8x8xf32>
    %82 = arith.truncf %79 : vector<8x8xf32> to vector<8x8xbf16>
    %83 = arith.truncf %80 : vector<8x8xf32> to vector<8x8xbf16>
    "tpu.trace_start"() <{level = 10 : i32, message = "nd,md->nm"}> : () -> ()
    %cst_34 = arith.constant dense<0.000000e+00> : vector<8x8xf32>
    %84 = tpu.matmul %82, %83, %cst_34 {dimension_numbers = #tpu.dot_dimension_numbers<[1], [1], [0], [0], [0, 0, 1, 0], [], []>} : vector<8x8xbf16>, vector<8x8xbf16>, vector<8x8xf32> -> vector<8x8xf32>
    "tpu.trace_stop"() : () -> ()
    %cst_35 = arith.constant dense<0xFF800000> : vector<8xf32>
    %85 = vector.multi_reduction <maximumf>, %84, %cst_35 [1] : vector<8x8xf32> to vector<8xf32>
    %86 = vector.shape_cast %85 : vector<8xf32> to vector<8x1xf32>
    %87 = vector.broadcast %86 : vector<8x1xf32> to vector<8x8xf32>
    %88 = arith.subf %84, %87 : vector<8x8xf32>
    %89 = math.exp %88 : vector<8x8xf32>
    %cst_36 = arith.constant dense<0.000000e+00> : vector<8xf32>
    %90 = vector.multi_reduction <add>, %89, %cst_36 [1] : vector<8x8xf32> to vector<8xf32>
    %91 = vector.shape_cast %90 : vector<8xf32> to vector<8x1xf32>
    %92 = tpu.reciprocal %91 {approx = true} : vector<8x1xf32> -> vector<8x1xf32>
    %93 = vector.broadcast %92 : vector<8x1xf32> to vector<8x8xf32>
    %94 = arith.mulf %89, %93 : vector<8x8xf32>
    %95 = arith.truncf %94 : vector<8x8xf32> to vector<8x8xbf16>
    %96 = arith.truncf %81 : vector<8x8xf32> to vector<8x8xbf16>
    %cst_37 = arith.constant dense<0.000000e+00> : vector<8x8xf32>
    %97 = tpu.matmul %95, %96, %cst_37 {dimension_numbers = #tpu.dot_dimension_numbers<[1], [0], [0], [1], [0, 0, 1, 1], [], []>} : vector<8x8xbf16>, vector<8x8xbf16>, vector<8x8xf32> -> vector<8x8xf32>
    %98 = arith.truncf %97 : vector<8x8xf32> to vector<8x8xbf16>
    %c0_38 = arith.constant 0 : index
    %c2 = arith.constant 2 : index
    %c0_39 = arith.constant 0 : index
    %c0_40 = arith.constant 0 : index
    %99 = vector.load %arg5[%c0_38, %c2, %c0_39, %c0_40] : memref<2x4x8x32xbf16, #tpu.memory_space<vmem>>, vector<1x1x8x32xbf16>
    %100 = vector.shape_cast %99 : vector<1x1x8x32xbf16> to vector<8x32xbf16>
    %cst_41 = arith.constant dense<0.000000e+00> : vector<8x32xf32>
    %101 = tpu.matmul %98, %100, %cst_41 {dimension_numbers = #tpu.dot_dimension_numbers<[1], [0], [0], [1], [0, 0, 1, 1], [], []>} : vector<8x8xbf16>, vector<8x32xbf16>, vector<8x32xf32> -> vector<8x32xf32>
    %102 = arith.addf %78, %101 : vector<8x32xf32>
    %103 = vector.extract_strided_slice %29 {offsets = [0, 24], sizes = [8, 8], strides = [1, 1]} : vector<8x96xf32> to vector<8x8xf32>
    %104 = vector.extract_strided_slice %29 {offsets = [0, 56], sizes = [8, 8], strides = [1, 1]} : vector<8x96xf32> to vector<8x8xf32>
    %105 = vector.extract_strided_slice %29 {offsets = [0, 88], sizes = [8, 8], strides = [1, 1]} : vector<8x96xf32> to vector<8x8xf32>
    %106 = arith.truncf %103 : vector<8x8xf32> to vector<8x8xbf16>
    %107 = arith.truncf %104 : vector<8x8xf32> to vector<8x8xbf16>
    "tpu.trace_start"() <{level = 10 : i32, message = "nd,md->nm"}> : () -> ()
    %cst_42 = arith.constant dense<0.000000e+00> : vector<8x8xf32>
    %108 = tpu.matmul %106, %107, %cst_42 {dimension_numbers = #tpu.dot_dimension_numbers<[1], [1], [0], [0], [0, 0, 1, 0], [], []>} : vector<8x8xbf16>, vector<8x8xbf16>, vector<8x8xf32> -> vector<8x8xf32>
    "tpu.trace_stop"() : () -> ()
    %cst_43 = arith.constant dense<0xFF800000> : vector<8xf32>
    %109 = vector.multi_reduction <maximumf>, %108, %cst_43 [1] : vector<8x8xf32> to vector<8xf32>
    %110 = vector.shape_cast %109 : vector<8xf32> to vector<8x1xf32>
    %111 = vector.broadcast %110 : vector<8x1xf32> to vector<8x8xf32>
    %112 = arith.subf %108, %111 : vector<8x8xf32>
    %113 = math.exp %112 : vector<8x8xf32>
    %cst_44 = arith.constant dense<0.000000e+00> : vector<8xf32>
    %114 = vector.multi_reduction <add>, %113, %cst_44 [1] : vector<8x8xf32> to vector<8xf32>
    %115 = vector.shape_cast %114 : vector<8xf32> to vector<8x1xf32>
    %116 = tpu.reciprocal %115 {approx = true} : vector<8x1xf32> -> vector<8x1xf32>
    %117 = vector.broadcast %116 : vector<8x1xf32> to vector<8x8xf32>
    %118 = arith.mulf %113, %117 : vector<8x8xf32>
    %119 = arith.truncf %118 : vector<8x8xf32> to vector<8x8xbf16>
    %120 = arith.truncf %105 : vector<8x8xf32> to vector<8x8xbf16>
    %cst_45 = arith.constant dense<0.000000e+00> : vector<8x8xf32>
    %121 = tpu.matmul %119, %120, %cst_45 {dimension_numbers = #tpu.dot_dimension_numbers<[1], [0], [0], [1], [0, 0, 1, 1], [], []>} : vector<8x8xbf16>, vector<8x8xbf16>, vector<8x8xf32> -> vector<8x8xf32>
    %122 = arith.truncf %121 : vector<8x8xf32> to vector<8x8xbf16>
    %c0_46 = arith.constant 0 : index
    %c3 = arith.constant 3 : index
    %c0_47 = arith.constant 0 : index
    %c0_48 = arith.constant 0 : index
    %123 = vector.load %arg5[%c0_46, %c3, %c0_47, %c0_48] : memref<2x4x8x32xbf16, #tpu.memory_space<vmem>>, vector<1x1x8x32xbf16>
    %124 = vector.shape_cast %123 : vector<1x1x8x32xbf16> to vector<8x32xbf16>
    %cst_49 = arith.constant dense<0.000000e+00> : vector<8x32xf32>
    %125 = tpu.matmul %122, %124, %cst_49 {dimension_numbers = #tpu.dot_dimension_numbers<[1], [0], [0], [1], [0, 0, 1, 1], [], []>} : vector<8x8xbf16>, vector<8x32xbf16>, vector<8x32xf32> -> vector<8x32xf32>
    %126 = arith.addf %102, %125 : vector<8x32xf32>
    %127 = arith.addf %1, %126 : vector<8x32xf32>
    %c0_50 = arith.constant 0 : index
    %c0_51 = arith.constant 0 : index
    %c0_52 = arith.constant 0 : index
    %128 = vector.load %arg6[%c0_50, %c0_51, %c0_52] : memref<2x1x32xf32, #tpu.memory_space<vmem>>, vector<1x1x32xf32>
    %129 = vector.shape_cast %128 : vector<1x1x32xf32> to vector<1x32xf32>
    %130 = vector.broadcast %129 : vector<1x32xf32> to vector<8x32xf32>
    %131 = arith.addf %127, %130 : vector<8x32xf32>
    %c0_53 = arith.constant 0 : index
    %c0_54 = arith.constant 0 : index
    %c0_55 = arith.constant 0 : index
    %132 = vector.load %arg7[%c0_53, %c0_54, %c0_55] : memref<2x1x32xf32, #tpu.memory_space<vmem>>, vector<1x1x32xf32>
    %133 = vector.shape_cast %132 : vector<1x1x32xf32> to vector<1x32xf32>
    %c0_56 = arith.constant 0 : index
    %c0_57 = arith.constant 0 : index
    %c0_58 = arith.constant 0 : index
    %134 = vector.load %arg8[%c0_56, %c0_57, %c0_58] : memref<2x1x32xf32, #tpu.memory_space<vmem>>, vector<1x1x32xf32>
    %135 = vector.shape_cast %134 : vector<1x1x32xf32> to vector<1x32xf32>
    %cst_59 = arith.constant dense<0.000000e+00> : vector<8xf32>
    %136 = vector.multi_reduction <add>, %131, %cst_59 [1] : vector<8x32xf32> to vector<8xf32>
    %137 = vector.shape_cast %136 : vector<8xf32> to vector<8x1xf32>
    %cst_60 = arith.constant 3.200000e+01 : f32
    %138 = vector.broadcast %cst_60 : f32 to vector<8x1xf32>
    %139 = arith.divf %137, %138 : vector<8x1xf32>
    %140 = vector.broadcast %139 : vector<8x1xf32> to vector<8x32xf32>
    %141 = arith.subf %131, %140 : vector<8x32xf32>
    %142 = arith.mulf %141, %141 : vector<8x32xf32>
    %cst_61 = arith.constant dense<0.000000e+00> : vector<8xf32>
    %143 = vector.multi_reduction <add>, %142, %cst_61 [1] : vector<8x32xf32> to vector<8xf32>
    %144 = vector.shape_cast %143 : vector<8xf32> to vector<8x1xf32>
    %cst_62 = arith.constant 3.200000e+01 : f32
    %145 = vector.broadcast %cst_62 : f32 to vector<8x1xf32>
    %146 = arith.divf %144, %145 : vector<8x1xf32>
    %cst_63 = arith.constant 9.99999974E-6 : f32
    %147 = vector.broadcast %cst_63 : f32 to vector<8x1xf32>
    %148 = arith.addf %146, %147 : vector<8x1xf32>
    %149 = math.rsqrt %148 : vector<8x1xf32>
    %150 = vector.broadcast %149 : vector<8x1xf32> to vector<8x32xf32>
    %151 = arith.mulf %141, %150 : vector<8x32xf32>
    %152 = vector.broadcast %133 : vector<1x32xf32> to vector<8x32xf32>
    %153 = arith.mulf %151, %152 : vector<8x32xf32>
    %154 = vector.broadcast %135 : vector<1x32xf32> to vector<8x32xf32>
    %155 = arith.addf %153, %154 : vector<8x32xf32>
    %156 = arith.truncf %155 : vector<8x32xf32> to vector<8x32xbf16>
    %c0_64 = arith.constant 0 : index
    %c0_65 = arith.constant 0 : index
    %c0_66 = arith.constant 0 : index
    %157 = vector.load %arg9[%c0_64, %c0_65, %c0_66] : memref<2x32x64xbf16, #tpu.memory_space<vmem>>, vector<1x32x64xbf16>
    %158 = vector.shape_cast %157 : vector<1x32x64xbf16> to vector<32x64xbf16>
    %cst_67 = arith.constant dense<0.000000e+00> : vector<8x64xf32>
    %159 = tpu.matmul %156, %158, %cst_67 {dimension_numbers = #tpu.dot_dimension_numbers<[1], [0], [0], [1], [0, 0, 1, 1], [], []>} : vector<8x32xbf16>, vector<32x64xbf16>, vector<8x64xf32> -> vector<8x64xf32>
    %c0_68 = arith.constant 0 : index
    %c0_69 = arith.constant 0 : index
    %c0_70 = arith.constant 0 : index
    %160 = vector.load %arg10[%c0_68, %c0_69, %c0_70] : memref<2x1x64xf32, #tpu.memory_space<vmem>>, vector<1x1x64xf32>
    %161 = vector.shape_cast %160 : vector<1x1x64xf32> to vector<1x64xf32>
    %162 = vector.broadcast %161 : vector<1x64xf32> to vector<8x64xf32>
    %163 = arith.addf %159, %162 : vector<8x64xf32>
    %cst_71 = arith.constant 5.000000e-01 : f32
    %164 = vector.broadcast %cst_71 : f32 to vector<8x64xf32>
    %165 = arith.mulf %164, %163 : vector<8x64xf32>
    %cst_72 = arith.constant 0.707106769 : f32
    %166 = vector.broadcast %cst_72 : f32 to vector<8x64xf32>
    %167 = arith.mulf %163, %166 : vector<8x64xf32>
    %168 = math.absf %167 : vector<8x64xf32>
    %cst_73 = arith.constant 0.327591091 : f32
    %169 = vector.broadcast %cst_73 : f32 to vector<8x64xf32>
    %170 = arith.mulf %169, %168 : vector<8x64xf32>
    %cst_74 = arith.constant 1.000000e+00 : f32
    %171 = vector.broadcast %cst_74 : f32 to vector<8x64xf32>
    %172 = arith.addf %171, %170 : vector<8x64xf32>
    %cst_75 = arith.constant 1.000000e+00 : f32
    %173 = vector.broadcast %cst_75 : f32 to vector<8x64xf32>
    %174 = arith.divf %173, %172 : vector<8x64xf32>
    %cst_76 = arith.constant 1.06140542 : f32
    %175 = vector.broadcast %cst_76 : f32 to vector<8x64xf32>
    %176 = arith.mulf %174, %175 : vector<8x64xf32>
    %cst_77 = arith.constant -1.45315206 : f32
    %177 = vector.broadcast %cst_77 : f32 to vector<8x64xf32>
    %178 = arith.addf %177, %176 : vector<8x64xf32>
    %179 = arith.mulf %174, %178 : vector<8x64xf32>
    %cst_78 = arith.constant 1.42141378 : f32
    %180 = vector.broadcast %cst_78 : f32 to vector<8x64xf32>
    %181 = arith.addf %180, %179 : vector<8x64xf32>
    %182 = arith.mulf %174, %181 : vector<8x64xf32>
    %cst_79 = arith.constant -0.284496725 : f32
    %183 = vector.broadcast %cst_79 : f32 to vector<8x64xf32>
    %184 = arith.addf %183, %182 : vector<8x64xf32>
    %185 = arith.mulf %174, %184 : vector<8x64xf32>
    %cst_80 = arith.constant 0.254829586 : f32
    %186 = vector.broadcast %cst_80 : f32 to vector<8x64xf32>
    %187 = arith.addf %186, %185 : vector<8x64xf32>
    %188 = arith.mulf %174, %187 : vector<8x64xf32>
    %cst_81 = arith.constant 0.000000e+00 : f32
    %189 = vector.broadcast %cst_81 : f32 to vector<8x64xf32>
    %190 = arith.subf %189, %168 : vector<8x64xf32>
    %191 = arith.mulf %190, %168 : vector<8x64xf32>
    %192 = math.exp %191 : vector<8x64xf32>
    %193 = arith.mulf %188, %192 : vector<8x64xf32>
    %cst_82 = arith.constant 1.000000e+00 : f32
    %194 = vector.broadcast %cst_82 : f32 to vector<8x64xf32>
    %195 = arith.subf %194, %193 : vector<8x64xf32>
    %cst_83 = arith.constant 0.000000e+00 : f32
    %196 = vector.broadcast %cst_83 : f32 to vector<8x64xf32>
    %197 = arith.cmpf olt, %167, %196 : vector<8x64xf32>
    %cst_84 = arith.constant 0.000000e+00 : f32
    %198 = vector.broadcast %cst_84 : f32 to vector<8x64xf32>
    %199 = arith.subf %198, %195 : vector<8x64xf32>
    %200 = arith.select %197, %199, %195 : vector<8x64xi1>, vector<8x64xf32>
    %cst_85 = arith.constant 1.000000e+00 : f32
    %201 = vector.broadcast %cst_85 : f32 to vector<8x64xf32>
    %202 = arith.addf %201, %200 : vector<8x64xf32>
    %203 = arith.mulf %165, %202 : vector<8x64xf32>
    %204 = arith.truncf %203 : vector<8x64xf32> to vector<8x64xbf16>
    %c0_86 = arith.constant 0 : index
    %c0_87 = arith.constant 0 : index
    %c0_88 = arith.constant 0 : index
    %205 = vector.load %arg11[%c0_86, %c0_87, %c0_88] : memref<2x64x32xbf16, #tpu.memory_space<vmem>>, vector<1x64x32xbf16>
    %206 = vector.shape_cast %205 : vector<1x64x32xbf16> to vector<64x32xbf16>
    %cst_89 = arith.constant dense<0.000000e+00> : vector<8x32xf32>
    %207 = tpu.matmul %204, %206, %cst_89 {dimension_numbers = #tpu.dot_dimension_numbers<[1], [0], [0], [1], [0, 0, 1, 1], [], []>} : vector<8x64xbf16>, vector<64x32xbf16>, vector<8x32xf32> -> vector<8x32xf32>
    %208 = arith.addf %131, %207 : vector<8x32xf32>
    %c0_90 = arith.constant 0 : index
    %c0_91 = arith.constant 0 : index
    %c0_92 = arith.constant 0 : index
    %209 = vector.load %arg12[%c0_90, %c0_91, %c0_92] : memref<2x1x32xf32, #tpu.memory_space<vmem>>, vector<1x1x32xf32>
    %210 = vector.shape_cast %209 : vector<1x1x32xf32> to vector<1x32xf32>
    %211 = vector.broadcast %210 : vector<1x32xf32> to vector<8x32xf32>
    %212 = arith.addf %208, %211 : vector<8x32xf32>
    %c1_93 = arith.constant 1 : index
    %c0_94 = arith.constant 0 : index
    %c0_95 = arith.constant 0 : index
    %213 = vector.load %arg2[%c1_93, %c0_94, %c0_95] : memref<2x1x32xf32, #tpu.memory_space<vmem>>, vector<1x1x32xf32>
    %214 = vector.shape_cast %213 : vector<1x1x32xf32> to vector<1x32xf32>
    %c1_96 = arith.constant 1 : index
    %c0_97 = arith.constant 0 : index
    %c0_98 = arith.constant 0 : index
    %215 = vector.load %arg3[%c1_96, %c0_97, %c0_98] : memref<2x1x32xf32, #tpu.memory_space<vmem>>, vector<1x1x32xf32>
    %216 = vector.shape_cast %215 : vector<1x1x32xf32> to vector<1x32xf32>
    %cst_99 = arith.constant dense<0.000000e+00> : vector<8xf32>
    %217 = vector.multi_reduction <add>, %212, %cst_99 [1] : vector<8x32xf32> to vector<8xf32>
    %218 = vector.shape_cast %217 : vector<8xf32> to vector<8x1xf32>
    %cst_100 = arith.constant 3.200000e+01 : f32
    %219 = vector.broadcast %cst_100 : f32 to vector<8x1xf32>
    %220 = arith.divf %218, %219 : vector<8x1xf32>
    %221 = vector.broadcast %220 : vector<8x1xf32> to vector<8x32xf32>
    %222 = arith.subf %212, %221 : vector<8x32xf32>
    %223 = arith.mulf %222, %222 : vector<8x32xf32>
    %cst_101 = arith.constant dense<0.000000e+00> : vector<8xf32>
    %224 = vector.multi_reduction <add>, %223, %cst_101 [1] : vector<8x32xf32> to vector<8xf32>
    %225 = vector.shape_cast %224 : vector<8xf32> to vector<8x1xf32>
    %cst_102 = arith.constant 3.200000e+01 : f32
    %226 = vector.broadcast %cst_102 : f32 to vector<8x1xf32>
    %227 = arith.divf %225, %226 : vector<8x1xf32>
    %cst_103 = arith.constant 9.99999974E-6 : f32
    %228 = vector.broadcast %cst_103 : f32 to vector<8x1xf32>
    %229 = arith.addf %227, %228 : vector<8x1xf32>
    %230 = math.rsqrt %229 : vector<8x1xf32>
    %231 = vector.broadcast %230 : vector<8x1xf32> to vector<8x32xf32>
    %232 = arith.mulf %222, %231 : vector<8x32xf32>
    %233 = vector.broadcast %214 : vector<1x32xf32> to vector<8x32xf32>
    %234 = arith.mulf %232, %233 : vector<8x32xf32>
    %235 = vector.broadcast %216 : vector<1x32xf32> to vector<8x32xf32>
    %236 = arith.addf %234, %235 : vector<8x32xf32>
    %237 = arith.truncf %236 : vector<8x32xf32> to vector<8x32xbf16>
    %c1_104 = arith.constant 1 : index
    %c0_105 = arith.constant 0 : index
    %c0_106 = arith.constant 0 : index
    %238 = vector.load %arg4[%c1_104, %c0_105, %c0_106] : memref<2x32x96xbf16, #tpu.memory_space<vmem>>, vector<1x32x96xbf16>
    %239 = vector.shape_cast %238 : vector<1x32x96xbf16> to vector<32x96xbf16>
    %cst_107 = arith.constant dense<0.000000e+00> : vector<8x96xf32>
    %240 = tpu.matmul %237, %239, %cst_107 {dimension_numbers = #tpu.dot_dimension_numbers<[1], [0], [0], [1], [0, 0, 1, 1], [], []>} : vector<8x32xbf16>, vector<32x96xbf16>, vector<8x96xf32> -> vector<8x96xf32>
    %cst_108 = arith.constant 0.000000e+00 : f32
    %241 = vector.broadcast %cst_108 : f32 to vector<8x32xf32>
    %242 = vector.extract_strided_slice %240 {offsets = [0, 0], sizes = [8, 8], strides = [1, 1]} : vector<8x96xf32> to vector<8x8xf32>
    %243 = vector.extract_strided_slice %240 {offsets = [0, 32], sizes = [8, 8], strides = [1, 1]} : vector<8x96xf32> to vector<8x8xf32>
    %244 = vector.extract_strided_slice %240 {offsets = [0, 64], sizes = [8, 8], strides = [1, 1]} : vector<8x96xf32> to vector<8x8xf32>
    %245 = arith.truncf %242 : vector<8x8xf32> to vector<8x8xbf16>
    %246 = arith.truncf %243 : vector<8x8xf32> to vector<8x8xbf16>
    "tpu.trace_start"() <{level = 10 : i32, message = "nd,md->nm"}> : () -> ()
    %cst_109 = arith.constant dense<0.000000e+00> : vector<8x8xf32>
    %247 = tpu.matmul %245, %246, %cst_109 {dimension_numbers = #tpu.dot_dimension_numbers<[1], [1], [0], [0], [0, 0, 1, 0], [], []>} : vector<8x8xbf16>, vector<8x8xbf16>, vector<8x8xf32> -> vector<8x8xf32>
    "tpu.trace_stop"() : () -> ()
    %cst_110 = arith.constant dense<0xFF800000> : vector<8xf32>
    %248 = vector.multi_reduction <maximumf>, %247, %cst_110 [1] : vector<8x8xf32> to vector<8xf32>
    %249 = vector.shape_cast %248 : vector<8xf32> to vector<8x1xf32>
    %250 = vector.broadcast %249 : vector<8x1xf32> to vector<8x8xf32>
    %251 = arith.subf %247, %250 : vector<8x8xf32>
    %252 = math.exp %251 : vector<8x8xf32>
    %cst_111 = arith.constant dense<0.000000e+00> : vector<8xf32>
    %253 = vector.multi_reduction <add>, %252, %cst_111 [1] : vector<8x8xf32> to vector<8xf32>
    %254 = vector.shape_cast %253 : vector<8xf32> to vector<8x1xf32>
    %255 = tpu.reciprocal %254 {approx = true} : vector<8x1xf32> -> vector<8x1xf32>
    %256 = vector.broadcast %255 : vector<8x1xf32> to vector<8x8xf32>
    %257 = arith.mulf %252, %256 : vector<8x8xf32>
    %258 = arith.truncf %257 : vector<8x8xf32> to vector<8x8xbf16>
    %259 = arith.truncf %244 : vector<8x8xf32> to vector<8x8xbf16>
    %cst_112 = arith.constant dense<0.000000e+00> : vector<8x8xf32>
    %260 = tpu.matmul %258, %259, %cst_112 {dimension_numbers = #tpu.dot_dimension_numbers<[1], [0], [0], [1], [0, 0, 1, 1], [], []>} : vector<8x8xbf16>, vector<8x8xbf16>, vector<8x8xf32> -> vector<8x8xf32>
    %261 = arith.truncf %260 : vector<8x8xf32> to vector<8x8xbf16>
    %c1_113 = arith.constant 1 : index
    %c0_114 = arith.constant 0 : index
    %c0_115 = arith.constant 0 : index
    %c0_116 = arith.constant 0 : index
    %262 = vector.load %arg5[%c1_113, %c0_114, %c0_115, %c0_116] : memref<2x4x8x32xbf16, #tpu.memory_space<vmem>>, vector<1x1x8x32xbf16>
    %263 = vector.shape_cast %262 : vector<1x1x8x32xbf16> to vector<8x32xbf16>
    %cst_117 = arith.constant dense<0.000000e+00> : vector<8x32xf32>
    %264 = tpu.matmul %261, %263, %cst_117 {dimension_numbers = #tpu.dot_dimension_numbers<[1], [0], [0], [1], [0, 0, 1, 1], [], []>} : vector<8x8xbf16>, vector<8x32xbf16>, vector<8x32xf32> -> vector<8x32xf32>
    %265 = arith.addf %241, %264 : vector<8x32xf32>
    %266 = vector.extract_strided_slice %240 {offsets = [0, 8], sizes = [8, 8], strides = [1, 1]} : vector<8x96xf32> to vector<8x8xf32>
    %267 = vector.extract_strided_slice %240 {offsets = [0, 40], sizes = [8, 8], strides = [1, 1]} : vector<8x96xf32> to vector<8x8xf32>
    %268 = vector.extract_strided_slice %240 {offsets = [0, 72], sizes = [8, 8], strides = [1, 1]} : vector<8x96xf32> to vector<8x8xf32>
    %269 = arith.truncf %266 : vector<8x8xf32> to vector<8x8xbf16>
    %270 = arith.truncf %267 : vector<8x8xf32> to vector<8x8xbf16>
    "tpu.trace_start"() <{level = 10 : i32, message = "nd,md->nm"}> : () -> ()
    %cst_118 = arith.constant dense<0.000000e+00> : vector<8x8xf32>
    %271 = tpu.matmul %269, %270, %cst_118 {dimension_numbers = #tpu.dot_dimension_numbers<[1], [1], [0], [0], [0, 0, 1, 0], [], []>} : vector<8x8xbf16>, vector<8x8xbf16>, vector<8x8xf32> -> vector<8x8xf32>
    "tpu.trace_stop"() : () -> ()
    %cst_119 = arith.constant dense<0xFF800000> : vector<8xf32>
    %272 = vector.multi_reduction <maximumf>, %271, %cst_119 [1] : vector<8x8xf32> to vector<8xf32>
    %273 = vector.shape_cast %272 : vector<8xf32> to vector<8x1xf32>
    %274 = vector.broadcast %273 : vector<8x1xf32> to vector<8x8xf32>
    %275 = arith.subf %271, %274 : vector<8x8xf32>
    %276 = math.exp %275 : vector<8x8xf32>
    %cst_120 = arith.constant dense<0.000000e+00> : vector<8xf32>
    %277 = vector.multi_reduction <add>, %276, %cst_120 [1] : vector<8x8xf32> to vector<8xf32>
    %278 = vector.shape_cast %277 : vector<8xf32> to vector<8x1xf32>
    %279 = tpu.reciprocal %278 {approx = true} : vector<8x1xf32> -> vector<8x1xf32>
    %280 = vector.broadcast %279 : vector<8x1xf32> to vector<8x8xf32>
    %281 = arith.mulf %276, %280 : vector<8x8xf32>
    %282 = arith.truncf %281 : vector<8x8xf32> to vector<8x8xbf16>
    %283 = arith.truncf %268 : vector<8x8xf32> to vector<8x8xbf16>
    %cst_121 = arith.constant dense<0.000000e+00> : vector<8x8xf32>
    %284 = tpu.matmul %282, %283, %cst_121 {dimension_numbers = #tpu.dot_dimension_numbers<[1], [0], [0], [1], [0, 0, 1, 1], [], []>} : vector<8x8xbf16>, vector<8x8xbf16>, vector<8x8xf32> -> vector<8x8xf32>
    %285 = arith.truncf %284 : vector<8x8xf32> to vector<8x8xbf16>
    %c1_122 = arith.constant 1 : index
    %c1_123 = arith.constant 1 : index
    %c0_124 = arith.constant 0 : index
    %c0_125 = arith.constant 0 : index
    %286 = vector.load %arg5[%c1_122, %c1_123, %c0_124, %c0_125] : memref<2x4x8x32xbf16, #tpu.memory_space<vmem>>, vector<1x1x8x32xbf16>
    %287 = vector.shape_cast %286 : vector<1x1x8x32xbf16> to vector<8x32xbf16>
    %cst_126 = arith.constant dense<0.000000e+00> : vector<8x32xf32>
    %288 = tpu.matmul %285, %287, %cst_126 {dimension_numbers = #tpu.dot_dimension_numbers<[1], [0], [0], [1], [0, 0, 1, 1], [], []>} : vector<8x8xbf16>, vector<8x32xbf16>, vector<8x32xf32> -> vector<8x32xf32>
    %289 = arith.addf %265, %288 : vector<8x32xf32>
    %290 = vector.extract_strided_slice %240 {offsets = [0, 16], sizes = [8, 8], strides = [1, 1]} : vector<8x96xf32> to vector<8x8xf32>
    %291 = vector.extract_strided_slice %240 {offsets = [0, 48], sizes = [8, 8], strides = [1, 1]} : vector<8x96xf32> to vector<8x8xf32>
    %292 = vector.extract_strided_slice %240 {offsets = [0, 80], sizes = [8, 8], strides = [1, 1]} : vector<8x96xf32> to vector<8x8xf32>
    %293 = arith.truncf %290 : vector<8x8xf32> to vector<8x8xbf16>
    %294 = arith.truncf %291 : vector<8x8xf32> to vector<8x8xbf16>
    "tpu.trace_start"() <{level = 10 : i32, message = "nd,md->nm"}> : () -> ()
    %cst_127 = arith.constant dense<0.000000e+00> : vector<8x8xf32>
    %295 = tpu.matmul %293, %294, %cst_127 {dimension_numbers = #tpu.dot_dimension_numbers<[1], [1], [0], [0], [0, 0, 1, 0], [], []>} : vector<8x8xbf16>, vector<8x8xbf16>, vector<8x8xf32> -> vector<8x8xf32>
    "tpu.trace_stop"() : () -> ()
    %cst_128 = arith.constant dense<0xFF800000> : vector<8xf32>
    %296 = vector.multi_reduction <maximumf>, %295, %cst_128 [1] : vector<8x8xf32> to vector<8xf32>
    %297 = vector.shape_cast %296 : vector<8xf32> to vector<8x1xf32>
    %298 = vector.broadcast %297 : vector<8x1xf32> to vector<8x8xf32>
    %299 = arith.subf %295, %298 : vector<8x8xf32>
    %300 = math.exp %299 : vector<8x8xf32>
    %cst_129 = arith.constant dense<0.000000e+00> : vector<8xf32>
    %301 = vector.multi_reduction <add>, %300, %cst_129 [1] : vector<8x8xf32> to vector<8xf32>
    %302 = vector.shape_cast %301 : vector<8xf32> to vector<8x1xf32>
    %303 = tpu.reciprocal %302 {approx = true} : vector<8x1xf32> -> vector<8x1xf32>
    %304 = vector.broadcast %303 : vector<8x1xf32> to vector<8x8xf32>
    %305 = arith.mulf %300, %304 : vector<8x8xf32>
    %306 = arith.truncf %305 : vector<8x8xf32> to vector<8x8xbf16>
    %307 = arith.truncf %292 : vector<8x8xf32> to vector<8x8xbf16>
    %cst_130 = arith.constant dense<0.000000e+00> : vector<8x8xf32>
    %308 = tpu.matmul %306, %307, %cst_130 {dimension_numbers = #tpu.dot_dimension_numbers<[1], [0], [0], [1], [0, 0, 1, 1], [], []>} : vector<8x8xbf16>, vector<8x8xbf16>, vector<8x8xf32> -> vector<8x8xf32>
    %309 = arith.truncf %308 : vector<8x8xf32> to vector<8x8xbf16>
    %c1_131 = arith.constant 1 : index
    %c2_132 = arith.constant 2 : index
    %c0_133 = arith.constant 0 : index
    %c0_134 = arith.constant 0 : index
    %310 = vector.load %arg5[%c1_131, %c2_132, %c0_133, %c0_134] : memref<2x4x8x32xbf16, #tpu.memory_space<vmem>>, vector<1x1x8x32xbf16>
    %311 = vector.shape_cast %310 : vector<1x1x8x32xbf16> to vector<8x32xbf16>
    %cst_135 = arith.constant dense<0.000000e+00> : vector<8x32xf32>
    %312 = tpu.matmul %309, %311, %cst_135 {dimension_numbers = #tpu.dot_dimension_numbers<[1], [0], [0], [1], [0, 0, 1, 1], [], []>} : vector<8x8xbf16>, vector<8x32xbf16>, vector<8x32xf32> -> vector<8x32xf32>
    %313 = arith.addf %289, %312 : vector<8x32xf32>
    %314 = vector.extract_strided_slice %240 {offsets = [0, 24], sizes = [8, 8], strides = [1, 1]} : vector<8x96xf32> to vector<8x8xf32>
    %315 = vector.extract_strided_slice %240 {offsets = [0, 56], sizes = [8, 8], strides = [1, 1]} : vector<8x96xf32> to vector<8x8xf32>
    %316 = vector.extract_strided_slice %240 {offsets = [0, 88], sizes = [8, 8], strides = [1, 1]} : vector<8x96xf32> to vector<8x8xf32>
    %317 = arith.truncf %314 : vector<8x8xf32> to vector<8x8xbf16>
    %318 = arith.truncf %315 : vector<8x8xf32> to vector<8x8xbf16>
    "tpu.trace_start"() <{level = 10 : i32, message = "nd,md->nm"}> : () -> ()
    %cst_136 = arith.constant dense<0.000000e+00> : vector<8x8xf32>
    %319 = tpu.matmul %317, %318, %cst_136 {dimension_numbers = #tpu.dot_dimension_numbers<[1], [1], [0], [0], [0, 0, 1, 0], [], []>} : vector<8x8xbf16>, vector<8x8xbf16>, vector<8x8xf32> -> vector<8x8xf32>
    "tpu.trace_stop"() : () -> ()
    %cst_137 = arith.constant dense<0xFF800000> : vector<8xf32>
    %320 = vector.multi_reduction <maximumf>, %319, %cst_137 [1] : vector<8x8xf32> to vector<8xf32>
    %321 = vector.shape_cast %320 : vector<8xf32> to vector<8x1xf32>
    %322 = vector.broadcast %321 : vector<8x1xf32> to vector<8x8xf32>
    %323 = arith.subf %319, %322 : vector<8x8xf32>
    %324 = math.exp %323 : vector<8x8xf32>
    %cst_138 = arith.constant dense<0.000000e+00> : vector<8xf32>
    %325 = vector.multi_reduction <add>, %324, %cst_138 [1] : vector<8x8xf32> to vector<8xf32>
    %326 = vector.shape_cast %325 : vector<8xf32> to vector<8x1xf32>
    %327 = tpu.reciprocal %326 {approx = true} : vector<8x1xf32> -> vector<8x1xf32>
    %328 = vector.broadcast %327 : vector<8x1xf32> to vector<8x8xf32>
    %329 = arith.mulf %324, %328 : vector<8x8xf32>
    %330 = arith.truncf %329 : vector<8x8xf32> to vector<8x8xbf16>
    %331 = arith.truncf %316 : vector<8x8xf32> to vector<8x8xbf16>
    %cst_139 = arith.constant dense<0.000000e+00> : vector<8x8xf32>
    %332 = tpu.matmul %330, %331, %cst_139 {dimension_numbers = #tpu.dot_dimension_numbers<[1], [0], [0], [1], [0, 0, 1, 1], [], []>} : vector<8x8xbf16>, vector<8x8xbf16>, vector<8x8xf32> -> vector<8x8xf32>
    %333 = arith.truncf %332 : vector<8x8xf32> to vector<8x8xbf16>
    %c1_140 = arith.constant 1 : index
    %c3_141 = arith.constant 3 : index
    %c0_142 = arith.constant 0 : index
    %c0_143 = arith.constant 0 : index
    %334 = vector.load %arg5[%c1_140, %c3_141, %c0_142, %c0_143] : memref<2x4x8x32xbf16, #tpu.memory_space<vmem>>, vector<1x1x8x32xbf16>
    %335 = vector.shape_cast %334 : vector<1x1x8x32xbf16> to vector<8x32xbf16>
    %cst_144 = arith.constant dense<0.000000e+00> : vector<8x32xf32>
    %336 = tpu.matmul %333, %335, %cst_144 {dimension_numbers = #tpu.dot_dimension_numbers<[1], [0], [0], [1], [0, 0, 1, 1], [], []>} : vector<8x8xbf16>, vector<8x32xbf16>, vector<8x32xf32> -> vector<8x32xf32>
    %337 = arith.addf %313, %336 : vector<8x32xf32>
    %338 = arith.addf %212, %337 : vector<8x32xf32>
    %c1_145 = arith.constant 1 : index
    %c0_146 = arith.constant 0 : index
    %c0_147 = arith.constant 0 : index
    %339 = vector.load %arg6[%c1_145, %c0_146, %c0_147] : memref<2x1x32xf32, #tpu.memory_space<vmem>>, vector<1x1x32xf32>
    %340 = vector.shape_cast %339 : vector<1x1x32xf32> to vector<1x32xf32>
    %341 = vector.broadcast %340 : vector<1x32xf32> to vector<8x32xf32>
    %342 = arith.addf %338, %341 : vector<8x32xf32>
    %c1_148 = arith.constant 1 : index
    %c0_149 = arith.constant 0 : index
    %c0_150 = arith.constant 0 : index
    %343 = vector.load %arg7[%c1_148, %c0_149, %c0_150] : memref<2x1x32xf32, #tpu.memory_space<vmem>>, vector<1x1x32xf32>
    %344 = vector.shape_cast %343 : vector<1x1x32xf32> to vector<1x32xf32>
    %c1_151 = arith.constant 1 : index
    %c0_152 = arith.constant 0 : index
    %c0_153 = arith.constant 0 : index
    %345 = vector.load %arg8[%c1_151, %c0_152, %c0_153] : memref<2x1x32xf32, #tpu.memory_space<vmem>>, vector<1x1x32xf32>
    %346 = vector.shape_cast %345 : vector<1x1x32xf32> to vector<1x32xf32>
    %cst_154 = arith.constant dense<0.000000e+00> : vector<8xf32>
    %347 = vector.multi_reduction <add>, %342, %cst_154 [1] : vector<8x32xf32> to vector<8xf32>
    %348 = vector.shape_cast %347 : vector<8xf32> to vector<8x1xf32>
    %cst_155 = arith.constant 3.200000e+01 : f32
    %349 = vector.broadcast %cst_155 : f32 to vector<8x1xf32>
    %350 = arith.divf %348, %349 : vector<8x1xf32>
    %351 = vector.broadcast %350 : vector<8x1xf32> to vector<8x32xf32>
    %352 = arith.subf %342, %351 : vector<8x32xf32>
    %353 = arith.mulf %352, %352 : vector<8x32xf32>
    %cst_156 = arith.constant dense<0.000000e+00> : vector<8xf32>
    %354 = vector.multi_reduction <add>, %353, %cst_156 [1] : vector<8x32xf32> to vector<8xf32>
    %355 = vector.shape_cast %354 : vector<8xf32> to vector<8x1xf32>
    %cst_157 = arith.constant 3.200000e+01 : f32
    %356 = vector.broadcast %cst_157 : f32 to vector<8x1xf32>
    %357 = arith.divf %355, %356 : vector<8x1xf32>
    %cst_158 = arith.constant 9.99999974E-6 : f32
    %358 = vector.broadcast %cst_158 : f32 to vector<8x1xf32>
    %359 = arith.addf %357, %358 : vector<8x1xf32>
    %360 = math.rsqrt %359 : vector<8x1xf32>
    %361 = vector.broadcast %360 : vector<8x1xf32> to vector<8x32xf32>
    %362 = arith.mulf %352, %361 : vector<8x32xf32>
    %363 = vector.broadcast %344 : vector<1x32xf32> to vector<8x32xf32>
    %364 = arith.mulf %362, %363 : vector<8x32xf32>
    %365 = vector.broadcast %346 : vector<1x32xf32> to vector<8x32xf32>
    %366 = arith.addf %364, %365 : vector<8x32xf32>
    %367 = arith.truncf %366 : vector<8x32xf32> to vector<8x32xbf16>
    %c1_159 = arith.constant 1 : index
    %c0_160 = arith.constant 0 : index
    %c0_161 = arith.constant 0 : index
    %368 = vector.load %arg9[%c1_159, %c0_160, %c0_161] : memref<2x32x64xbf16, #tpu.memory_space<vmem>>, vector<1x32x64xbf16>
    %369 = vector.shape_cast %368 : vector<1x32x64xbf16> to vector<32x64xbf16>
    %cst_162 = arith.constant dense<0.000000e+00> : vector<8x64xf32>
    %370 = tpu.matmul %367, %369, %cst_162 {dimension_numbers = #tpu.dot_dimension_numbers<[1], [0], [0], [1], [0, 0, 1, 1], [], []>} : vector<8x32xbf16>, vector<32x64xbf16>, vector<8x64xf32> -> vector<8x64xf32>
    %c1_163 = arith.constant 1 : index
    %c0_164 = arith.constant 0 : index
    %c0_165 = arith.constant 0 : index
    %371 = vector.load %arg10[%c1_163, %c0_164, %c0_165] : memref<2x1x64xf32, #tpu.memory_space<vmem>>, vector<1x1x64xf32>
    %372 = vector.shape_cast %371 : vector<1x1x64xf32> to vector<1x64xf32>
    %373 = vector.broadcast %372 : vector<1x64xf32> to vector<8x64xf32>
    %374 = arith.addf %370, %373 : vector<8x64xf32>
    %cst_166 = arith.constant 5.000000e-01 : f32
    %375 = vector.broadcast %cst_166 : f32 to vector<8x64xf32>
    %376 = arith.mulf %375, %374 : vector<8x64xf32>
    %cst_167 = arith.constant 0.707106769 : f32
    %377 = vector.broadcast %cst_167 : f32 to vector<8x64xf32>
    %378 = arith.mulf %374, %377 : vector<8x64xf32>
    %379 = math.absf %378 : vector<8x64xf32>
    %cst_168 = arith.constant 0.327591091 : f32
    %380 = vector.broadcast %cst_168 : f32 to vector<8x64xf32>
    %381 = arith.mulf %380, %379 : vector<8x64xf32>
    %cst_169 = arith.constant 1.000000e+00 : f32
    %382 = vector.broadcast %cst_169 : f32 to vector<8x64xf32>
    %383 = arith.addf %382, %381 : vector<8x64xf32>
    %cst_170 = arith.constant 1.000000e+00 : f32
    %384 = vector.broadcast %cst_170 : f32 to vector<8x64xf32>
    %385 = arith.divf %384, %383 : vector<8x64xf32>
    %cst_171 = arith.constant 1.06140542 : f32
    %386 = vector.broadcast %cst_171 : f32 to vector<8x64xf32>
    %387 = arith.mulf %385, %386 : vector<8x64xf32>
    %cst_172 = arith.constant -1.45315206 : f32
    %388 = vector.broadcast %cst_172 : f32 to vector<8x64xf32>
    %389 = arith.addf %388, %387 : vector<8x64xf32>
    %390 = arith.mulf %385, %389 : vector<8x64xf32>
    %cst_173 = arith.constant 1.42141378 : f32
    %391 = vector.broadcast %cst_173 : f32 to vector<8x64xf32>
    %392 = arith.addf %391, %390 : vector<8x64xf32>
    %393 = arith.mulf %385, %392 : vector<8x64xf32>
    %cst_174 = arith.constant -0.284496725 : f32
    %394 = vector.broadcast %cst_174 : f32 to vector<8x64xf32>
    %395 = arith.addf %394, %393 : vector<8x64xf32>
    %396 = arith.mulf %385, %395 : vector<8x64xf32>
    %cst_175 = arith.constant 0.254829586 : f32
    %397 = vector.broadcast %cst_175 : f32 to vector<8x64xf32>
    %398 = arith.addf %397, %396 : vector<8x64xf32>
    %399 = arith.mulf %385, %398 : vector<8x64xf32>
    %cst_176 = arith.constant 0.000000e+00 : f32
    %400 = vector.broadcast %cst_176 : f32 to vector<8x64xf32>
    %401 = arith.subf %400, %379 : vector<8x64xf32>
    %402 = arith.mulf %401, %379 : vector<8x64xf32>
    %403 = math.exp %402 : vector<8x64xf32>
    %404 = arith.mulf %399, %403 : vector<8x64xf32>
    %cst_177 = arith.constant 1.000000e+00 : f32
    %405 = vector.broadcast %cst_177 : f32 to vector<8x64xf32>
    %406 = arith.subf %405, %404 : vector<8x64xf32>
    %cst_178 = arith.constant 0.000000e+00 : f32
    %407 = vector.broadcast %cst_178 : f32 to vector<8x64xf32>
    %408 = arith.cmpf olt, %378, %407 : vector<8x64xf32>
    %cst_179 = arith.constant 0.000000e+00 : f32
    %409 = vector.broadcast %cst_179 : f32 to vector<8x64xf32>
    %410 = arith.subf %409, %406 : vector<8x64xf32>
    %411 = arith.select %408, %410, %406 : vector<8x64xi1>, vector<8x64xf32>
    %cst_180 = arith.constant 1.000000e+00 : f32
    %412 = vector.broadcast %cst_180 : f32 to vector<8x64xf32>
    %413 = arith.addf %412, %411 : vector<8x64xf32>
    %414 = arith.mulf %376, %413 : vector<8x64xf32>
    %415 = arith.truncf %414 : vector<8x64xf32> to vector<8x64xbf16>
    %c1_181 = arith.constant 1 : index
    %c0_182 = arith.constant 0 : index
    %c0_183 = arith.constant 0 : index
    %416 = vector.load %arg11[%c1_181, %c0_182, %c0_183] : memref<2x64x32xbf16, #tpu.memory_space<vmem>>, vector<1x64x32xbf16>
    %417 = vector.shape_cast %416 : vector<1x64x32xbf16> to vector<64x32xbf16>
    %cst_184 = arith.constant dense<0.000000e+00> : vector<8x32xf32>
    %418 = tpu.matmul %415, %417, %cst_184 {dimension_numbers = #tpu.dot_dimension_numbers<[1], [0], [0], [1], [0, 0, 1, 1], [], []>} : vector<8x64xbf16>, vector<64x32xbf16>, vector<8x32xf32> -> vector<8x32xf32>
    %419 = arith.addf %342, %418 : vector<8x32xf32>
    %c1_185 = arith.constant 1 : index
    %c0_186 = arith.constant 0 : index
    %c0_187 = arith.constant 0 : index
    %420 = vector.load %arg12[%c1_185, %c0_186, %c0_187] : memref<2x1x32xf32, #tpu.memory_space<vmem>>, vector<1x1x32xf32>
    %421 = vector.shape_cast %420 : vector<1x1x32xf32> to vector<1x32xf32>
    %422 = vector.broadcast %421 : vector<1x32xf32> to vector<8x32xf32>
    %423 = arith.addf %419, %422 : vector<8x32xf32>
    %c0_188 = arith.constant 0 : index
    %c0_189 = arith.constant 0 : index
    %424 = vector.load %arg13[%c0_188, %c0_189] : memref<1x32xf32, #tpu.memory_space<vmem>>, vector<1x32xf32>
    %c0_190 = arith.constant 0 : index
    %c0_191 = arith.constant 0 : index
    %425 = vector.load %arg14[%c0_190, %c0_191] : memref<1x32xf32, #tpu.memory_space<vmem>>, vector<1x32xf32>
    %cst_192 = arith.constant dense<0.000000e+00> : vector<8xf32>
    %426 = vector.multi_reduction <add>, %423, %cst_192 [1] : vector<8x32xf32> to vector<8xf32>
    %427 = vector.shape_cast %426 : vector<8xf32> to vector<8x1xf32>
    %cst_193 = arith.constant 3.200000e+01 : f32
    %428 = vector.broadcast %cst_193 : f32 to vector<8x1xf32>
    %429 = arith.divf %427, %428 : vector<8x1xf32>
    %430 = vector.broadcast %429 : vector<8x1xf32> to vector<8x32xf32>
    %431 = arith.subf %423, %430 : vector<8x32xf32>
    %432 = arith.mulf %431, %431 : vector<8x32xf32>
    %cst_194 = arith.constant dense<0.000000e+00> : vector<8xf32>
    %433 = vector.multi_reduction <add>, %432, %cst_194 [1] : vector<8x32xf32> to vector<8xf32>
    %434 = vector.shape_cast %433 : vector<8xf32> to vector<8x1xf32>
    %cst_195 = arith.constant 3.200000e+01 : f32
    %435 = vector.broadcast %cst_195 : f32 to vector<8x1xf32>
    %436 = arith.divf %434, %435 : vector<8x1xf32>
    %cst_196 = arith.constant 9.99999974E-6 : f32
    %437 = vector.broadcast %cst_196 : f32 to vector<8x1xf32>
    %438 = arith.addf %436, %437 : vector<8x1xf32>
    %439 = math.rsqrt %438 : vector<8x1xf32>
    %440 = vector.broadcast %439 : vector<8x1xf32> to vector<8x32xf32>
    %441 = arith.mulf %431, %440 : vector<8x32xf32>
    %442 = vector.broadcast %424 : vector<1x32xf32> to vector<8x32xf32>
    %443 = arith.mulf %441, %442 : vector<8x32xf32>
    %444 = vector.broadcast %425 : vector<1x32xf32> to vector<8x32xf32>
    %445 = arith.addf %443, %444 : vector<8x32xf32>
    %c0_197 = arith.constant 0 : index
    %c0_198 = arith.constant 0 : index
    %c0_199 = arith.constant 0 : index
    %446 = vector.load %arg15[%c0_197, %c0_198, %c0_199] : memref<1x8x32xf32, #tpu.memory_space<vmem>>, vector<1x8x32xf32>
    %447 = vector.shape_cast %446 : vector<1x8x32xf32> to vector<8x32xf32>
    %448 = vector.shape_cast %445 : vector<8x32xf32> to vector<1x8x32xf32>
    tpu.vector_store %arg15[%c0_197, %c0_198, %c0_199], %448 {strides = array<i32>} : memref<1x8x32xf32, #tpu.memory_space<vmem>>, vector<1x8x32xf32>,
    return
  }
  func.func @transform_0(%arg0: i32) -> (i32, i32, i32) {
    %c0_i32 = arith.constant 0 : i32
    %c0_i32_0 = arith.constant 0 : i32
    %c0_i32_1 = arith.constant 0 : i32
    return %arg0, %c0_i32, %c0_i32_0 : i32, i32, i32
  }
  func.func @transform_1(%arg0: i32) -> (i32, i32, i32) {
    %c0_i32 = arith.constant 0 : i32
    %c0_i32_0 = arith.constant 0 : i32
    %c0_i32_1 = arith.constant 0 : i32
    %c0_i32_2 = arith.constant 0 : i32
    return %c0_i32, %c0_i32_0, %c0_i32_1 : i32, i32, i32
  }
  func.func @transform_2(%arg0: i32) -> (i32, i32, i32) {
    %c0_i32 = arith.constant 0 : i32
    %c0_i32_0 = arith.constant 0 : i32
    %c0_i32_1 = arith.constant 0 : i32
    %c0_i32_2 = arith.constant 0 : i32
    return %c0_i32, %c0_i32_0, %c0_i32_1 : i32, i32, i32
  }
  func.func @transform_3(%arg0: i32) -> (i32, i32, i32) {
    %c0_i32 = arith.constant 0 : i32
    %c0_i32_0 = arith.constant 0 : i32
    %c0_i32_1 = arith.constant 0 : i32
    %c0_i32_2 = arith.constant 0 : i32
    return %c0_i32, %c0_i32_0, %c0_i32_1 : i32, i32, i32
  }
  func.func @transform_4(%arg0: i32) -> (i32, i32, i32, i32) {
    %c0_i32 = arith.constant 0 : i32
    %c0_i32_0 = arith.constant 0 : i32
    %c0_i32_1 = arith.constant 0 : i32
    %c0_i32_2 = arith.constant 0 : i32
    %c0_i32_3 = arith.constant 0 : i32
    return %c0_i32, %c0_i32_0, %c0_i32_1, %c0_i32_2 : i32, i32, i32, i32
  }
  func.func @transform_5(%arg0: i32) -> (i32, i32, i32) {
    %c0_i32 = arith.constant 0 : i32
    %c0_i32_0 = arith.constant 0 : i32
    %c0_i32_1 = arith.constant 0 : i32
    %c0_i32_2 = arith.constant 0 : i32
    return %c0_i32, %c0_i32_0, %c0_i32_1 : i32, i32, i32
  }
  func.func @transform_6(%arg0: i32) -> (i32, i32, i32) {
    %c0_i32 = arith.constant 0 : i32
    %c0_i32_0 = arith.constant 0 : i32
    %c0_i32_1 = arith.constant 0 : i32
    %c0_i32_2 = arith.constant 0 : i32
    return %c0_i32, %c0_i32_0, %c0_i32_1 : i32, i32, i32
  }
  func.func @transform_7(%arg0: i32) -> (i32, i32, i32) {
    %c0_i32 = arith.constant 0 : i32
    %c0_i32_0 = arith.constant 0 : i32
    %c0_i32_1 = arith.constant 0 : i32
    %c0_i32_2 = arith.constant 0 : i32
    return %c0_i32, %c0_i32_0, %c0_i32_1 : i32, i32, i32
  }
  func.func @transform_8(%arg0: i32) -> (i32, i32, i32) {
    %c0_i32 = arith.constant 0 : i32
    %c0_i32_0 = arith.constant 0 : i32
    %c0_i32_1 = arith.constant 0 : i32
    %c0_i32_2 = arith.constant 0 : i32
    return %c0_i32, %c0_i32_0, %c0_i32_1 : i32, i32, i32
  }
  func.func @transform_9(%arg0: i32) -> (i32, i32, i32) {
    %c0_i32 = arith.constant 0 : i32
    %c0_i32_0 = arith.constant 0 : i32
    %c0_i32_1 = arith.constant 0 : i32
    %c0_i32_2 = arith.constant 0 : i32
    return %c0_i32, %c0_i32_0, %c0_i32_1 : i32, i32, i32
  }
  func.func @transform_10(%arg0: i32) -> (i32, i32, i32) {
    %c0_i32 = arith.constant 0 : i32
    %c0_i32_0 = arith.constant 0 : i32
    %c0_i32_1 = arith.constant 0 : i32
    %c0_i32_2 = arith.constant 0 : i32
    return %c0_i32, %c0_i32_0, %c0_i32_1 : i32, i32, i32
  }
  func.func @transform_11(%arg0: i32) -> (i32, i32, i32) {
    %c0_i32 = arith.constant 0 : i32
    %c0_i32_0 = arith.constant 0 : i32
    %c0_i32_1 = arith.constant 0 : i32
    %c0_i32_2 = arith.constant 0 : i32
    return %c0_i32, %c0_i32_0, %c0_i32_1 : i32, i32, i32
  }
  func.func @transform_12(%arg0: i32) -> (i32, i32) {
    %c0_i32 = arith.constant 0 : i32
    %c0_i32_0 = arith.constant 0 : i32
    %c0_i32_1 = arith.constant 0 : i32
    return %c0_i32, %c0_i32_0 : i32, i32
  }
  func.func @transform_13(%arg0: i32) -> (i32, i32) {
    %c0_i32 = arith.constant 0 : i32
    %c0_i32_0 = arith.constant 0 : i32
    %c0_i32_1 = arith.constant 0 : i32
    return %c0_i32, %c0_i32_0 : i32, i32
  }
  func.func @transform_14(%arg0: i32) -> (i32, i32, i32) {
    %c0_i32 = arith.constant 0 : i32
    %c0_i32_0 = arith.constant 0 : i32
    %c0_i32_1 = arith.constant 0 : i32
    return %arg0, %c0_i32, %c0_i32_0 : i32, i32, i32
  }
}

</mosaic_0001>

<bundles_post_ra>
// kernel: tpu_custom_call.1
= control target key start
LH: loop header
LB: loop body
LE: loop exit
PB: predicated region body
PF: predicated region fallthrough
CT: control target
= control target key end

     0   :  { %s4106_s0 = inlined_call_operand.hbm [shape: f32[2,8,32], index: 0, kind: input, shape index: {}]   ;;  %s4107_s1 = inlined_call_operand.vmem [shape: f32[2,1,32], index: 1, kind: input, shape index: {}]   ;;  %s4108_s2 = inlined_call_operand.vmem [shape: f32[2,1,32], index: 2, kind: input, shape index: {}]   ;;  %s4109_s3 = inlined_call_operand.vmem [shape: bf16[2,32,96], index: 3, kind: input, shape index: {}]   ;;  %s4110_s4 = inlined_call_operand.vmem [shape: bf16[2,4,8,32], index: 4, kind: input, shape index: {}]   ;;  %s4111_s5 = inlined_call_operand.hbm [shape: f32[2,1,32], index: 5, kind: input, shape index: {}]   ;;  %s4112_s6 = inlined_call_operand.hbm [shape: f32[2,1,32], index: 6, kind: input, shape index: {}]   ;;  %s4113_s7 = inlined_call_operand.hbm [shape: f32[2,1,32], index: 7, kind: input, shape index: {}]   ;;  %s4114_s8 = inlined_call_operand.vmem [shape: bf16[2,32,64], index: 8, kind: input, shape index: {}]   ;;  %s4115_s9 = inlined_call_operand.hbm [shape: f32[2,1,64], index: 9, kind: input, shape index: {}]   ;;  %s4116_s10 = inlined_call_operand.vmem [shape: bf16[2,64,32], index: 10, kind: input, shape index: {}]   ;;  %s4117_s11 = inlined_call_operand.vmem [shape: f32[2,1,32], index: 11, kind: input, shape index: {}]   ;;  %s4118_s12 = inlined_call_operand.vmem [shape: f32[1,32], index: 12, kind: input, shape index: {}]   ;;  %s4119_s13 = inlined_call_operand.vmem [shape: f32[1,32], index: 13, kind: input, shape index: {}]   ;;  %s4120_s14 = inlined_call_operand.hbm [shape: f32[2,8,32], index: 14, kind: output, shape index: {}]  }
   0x1   :  { %4136 = sst [smem:[#allocation16_spill]] %s4106_s0 }
   0x2   :  { %4137 = sst [smem:[#allocation17_spill]] %s4107_s1 }
   0x3   :  { %4138 = sst [smem:[#allocation18_spill]] %s4108_s2 }
   0x4   :  { %4139 = sst [smem:[#allocation19_spill]] %s4109_s3 }
   0x5   :  { %4140 = sst [smem:[#allocation20_spill]] %s4111_s5 }
   0x6   :  { %4141 = sst [smem:[#allocation21_spill]] %s4114_s8 }
   0x7   :  { %4142 = sst [smem:[#allocation22_spill]] %s4116_s10 }
   0x8   :  { %4143 = sst [smem:[#allocation23_spill]] %s4117_s11 }
   0x9   :  { %4144 = sst [smem:[#allocation24_spill]] %s4118_s12 }
   0xa   :  { %4145 = sst [smem:[#allocation25_spill]] %s4119_s13 }
   0xb   :  { %4146 = sst [smem:[#allocation26_spill]] %s4120_s14 }
   0xc   :  { %19 = vsyncpa [#allocation3], 0 }
   0xd   :  { %21 = vsyncpa [#allocation3 + $0x1], 0 }
   0xe   :  { %22 = vsyncpa [#allocation6], 0 }
   0xf   :  { %23 = vsyncpa [#allocation9], 0 }
  0x10   :  { %24 = vsyncpa [#allocation4], 0 }
  0x11   :  { %26 = vsyncpa [#allocation4 + $0x1], 0  ;;  %s3457_s29 = smov 0   ;;  %s3459_s30 = smov 0  }
  0x12   :  { %s3461_s15 = smov 0   ;;  %s3463_s16 = smov 0  }
  0x13 LB: > { %s3361_s17 = smov [#allocation5]   ;;  %s3478_s19 = sadd.s32 4294967295, %s3359_s16   ;;  %s3359_s16 = sphi %s3463_s16, %s4186_s16   ;;  %s3355_s15 = sphi %s3461_s15, %s4185_s15   ;;  %s3351_s30 = sphi %s3459_s30, %s4184_s30   ;;  %s3347_s29 = sphi %s3457_s29, %s4183_s29  }
  0x14   : > { %s386_s18 = sshll.u32 %s3361_s17, 4  ;;  %p2598_p0 = scmp.ge.s32.totalorder %s3359_s16, 1  ;;  %s3483_s18 = int_to_ptr.vmem [resolvable:$true] %s386_s18 }
  0x15   : > { %p4125_p1 = scmp.eq.s32.totalorder %s3478_s19, 0  ;;  %p362_p2 = scmp.lt.s32.totalorder %s3359_s16, 3 }
  0x16   : > { %s3362_s21 = smov [#allocation8]   ;;  %s3363_s24 = smov [#allocation7]  }
  0x17   : > { %p3485_p3 = pnand %p2598_p0, %p362_p2  ;;  %s412_s22 = sshll.u32 %s3362_s21, 4  ;;  %s3498_s22 = int_to_ptr.vmem [resolvable:$true] %s412_s22 }
  0x18   : > { %s399_s25 = sshll.u32 %s3363_s24, 4  ;;  %s4149_s5 = sld [smem:[#allocation20_spill]]  ;;  %s3500_s25 = int_to_ptr.vmem [resolvable:$true] %s399_s25 }
  0x19   : > { %s4147_s20 = scalar_select %p3485_p3, 1, 0 }
  0x1a   : > { %p2995_p5 = pneg %p3485_p3 }
  0x1c   : > { %p3494_p6 = pnand %p2995_p5, %p4125_p1 }
  0x1e   : > { %s3143_s28 = scalar_lea.hbm %s4149_s5, 32  ;;  %p3510_p8 = pneg %p3494_p6 }
  0x1f   : > { %p3144_p7 = scmp.ne.s32.totalorder %s4149_s5, %s3143_s28  ;;  %p3150_p11 = scmp.lt.u32.totalorder %s3143_s28, %s4149_s5 }
  0x21   : > { %p3146_p9 = pnand %p3510_p8, %p3144_p7 }
  0x23   : > { %p3147_p10 = pneg %p3146_p9 }
  0x25   : > { %p3152_p12 = pnand %p3150_p11, %p3147_p10 }
  0x27   : > { %3155 = shalt.err (!%p3152_p12)
}
  0x28   : > { %s3156_s14 = scalar_lea.vmem %s3483_s18, 32  ;;  %p3164_p5 = scmp.lt.s32.totalorder %s3483_s18, %s3483_s18 }
  0x29   : > { %p3157_p13 = scmp.ne.s32.totalorder %s3483_s18, %s3156_s14  ;;  %p3165_p4 = scmp.lt.s32.totalorder %s3156_s14, %s3156_s14 }
  0x2b   : > { %p3159_p0 = pnand %p3157_p13, %p3510_p8  ;;  %p3166_p7 = por %p3165_p4, %p3164_p5 }
  0x2d   : > { %p3160_p2 = pneg %p3159_p0 }
  0x2f   : > { %p3167_p9 = pnand %p3166_p7, %p3160_p2 }
  0x31   : > { %3170 = shalt.err (!%p3167_p9)
}
  0x32   : > { %s3364_s26 = smov 16   ;;  %s3365_s13 = smov 1  }
  0x33   : > { %2998 = dma.hbm_to_vmem [thread:$0]  (!%p3494_p6), %s4149_s5, 32, %s3483_s18, [#allocation6], %s3364_s26, %s3364_s26, %s3365_s13  }
  0x34   : > { %s3171_s14 = scalar_lea.hbm %s4113_s7, 32 }
  0x35   : > { %p3172_p4 = scmp.ne.s32.totalorder %s4113_s7, %s3171_s14  ;;  %p3178_p12 = scmp.lt.u32.totalorder %s3171_s14, %s4113_s7 }
  0x37   : > { %p3174_p10 = pnand %p3172_p4, %p3510_p8 }
  0x39   : > { %p3175_p11 = pneg %p3174_p10 }
  0x3b   : > { %p3180_p13 = pnand %p3178_p12, %p3175_p11 }
  0x3d   : > { %3183 = shalt.err (!%p3180_p13)
}
  0x3e   : > { %s3184_s18 = scalar_lea.vmem %s3498_s22, 32  ;;  %p3192_p7 = scmp.lt.s32.totalorder %s3498_s22, %s3498_s22 }
  0x3f   : > { %p3185_p0 = scmp.ne.s32.totalorder %s3498_s22, %s3184_s18  ;;  %p3193_p9 = scmp.lt.s32.totalorder %s3184_s18, %s3184_s18 }
  0x41   : > { %p3187_p2 = pnand %p3185_p0, %p3510_p8  ;;  %p3194_p4 = por %p3193_p9, %p3192_p7 }
  0x43   : > { %p3188_p5 = pneg %p3187_p2 }
  0x45   : > { %p3195_p10 = pnand %p3194_p4, %p3188_p5 }
  0x47   : > { %3198 = shalt.err (!%p3195_p10)
}
  0x48   : > { %3004 = dma.hbm_to_vmem [thread:$0]  (!%p3494_p6), %s4113_s7, 32, %s3498_s22, [#allocation9], %s3364_s26, %s3364_s26, %s3365_s13  }
  0x49   : > { %s3199_s27 = scalar_lea.hbm %s4112_s6, 32 }
  0x4a   : > { %p3200_p11 = scmp.ne.s32.totalorder %s4112_s6, %s3199_s27  ;;  %p3206_p0 = scmp.lt.u32.totalorder %s3199_s27, %s4112_s6 }
  0x4c   : > { %p3202_p12 = pnand %p3200_p11, %p3510_p8 }
  0x4e   : > { %p3203_p13 = pneg %p3202_p12 }
  0x50   : > { %p3208_p2 = pnand %p3206_p0, %p3203_p13 }
  0x52   : > { %3211 = shalt.err (!%p3208_p2)
}
  0x53   : > { %s3212_s22 = scalar_lea.vmem %s3500_s25, 32  ;;  %p3220_p4 = scmp.lt.s32.totalorder %s3500_s25, %s3500_s25 }
  0x54   : > { %p3213_p5 = scmp.ne.s32.totalorder %s3500_s25, %s3212_s22  ;;  %p3221_p10 = scmp.lt.s32.totalorder %s3212_s22, %s3212_s22 }
  0x56   : > { %p3215_p7 = pnand %p3213_p5, %p3510_p8  ;;  %p3222_p11 = por %p3221_p10, %p3220_p4 }
  0x58   : > { %p3216_p9 = pneg %p3215_p7 }
  0x5a   : > { %p3223_p12 = pnand %p3222_p11, %p3216_p9 }
  0x5c   : > { %3226 = shalt.err (!%p3223_p12)
}
  0x5d   : > { %3001 = dma.hbm_to_vmem [thread:$0]  (!%p3494_p6), %s4112_s6, 32, %s3500_s25, [#allocation6], %s3364_s26, %s3364_s26, %s3365_s13  }
  0x5e   : > { %s3366_s10 = smov [#allocation10]   ;;  %s3227_s28 = scalar_lea.hbm %s4115_s9, 32 }
  0x5f   : > { %s428_s11 = sshll.u32 %s3366_s10, 4  ;;  %p3228_p13 = scmp.ne.s32.totalorder %s4115_s9, %s3227_s28  ;;  %s429_s11 = int_to_ptr.vmem [resolvable:$true] %s428_s11 }
  0x60   : > { %p3234_p5 = scmp.lt.u32.totalorder %s3227_s28, %s4115_s9 }
  0x61   : > { %p3230_p0 = pnand %p3228_p13, %p3510_p8 }
  0x63   : > { %p3231_p2 = pneg %p3230_p0 }
  0x65   : > { %p3236_p7 = pnand %p3234_p5, %p3231_p2 }
  0x67   : > { %3239 = shalt.err (!%p3236_p7)
}
  0x68   : > { %s3240_s25 = scalar_lea.vmem %s429_s11, 32  ;;  %p3248_p11 = scmp.lt.s32.totalorder %s429_s11, %s429_s11 }
  0x69   : > { %p3241_p9 = scmp.ne.s32.totalorder %s429_s11, %s3240_s25  ;;  %p3249_p12 = scmp.lt.s32.totalorder %s3240_s25, %s3240_s25 }
  0x6b   : > { %p3243_p4 = pnand %p3241_p9, %p3510_p8  ;;  %p3250_p1 = por %p3249_p12, %p3248_p11 }
  0x6d   : > { %p3244_p10 = pneg %p3243_p4 }
  0x6f   : > { %p3251_p3 = pnand %p3250_p1, %p3244_p10 }
  0x71   : > { %3254 = shalt.err (!%p3251_p3)
}
  0x72   : > { %3007 = dma.hbm_to_vmem [thread:$0]  (!%p3494_p6), %s4115_s9, 32, %s429_s11, [#allocation9], %s3364_s26, %s3364_s26, %s3365_s13  }
  0x73   : > { %s2597_s23 = sadd.s32 4294967294, %s3359_s16   ;;  %s3609_s21 = sadd.s32 1, %s3359_s16  }
  0x74   : > { %s36_s10 = ssub.s32 %s3359_s16, %s3609_s21  ;;  %s39_s12 = sadd.s32 1, %s3355_s15 }
  0x75   : > { %p37_p1 = scmp.eq.s32.totalorder %s36_s10, 0  ;;  %p46_p3 = scmp.ne.s32.totalorder %s3355_s15, %s3351_s30 }
  0x76   : > { %p47_p8 = scmp.eq.s32.totalorder %s3359_s16, 0  ;;  %p52_p13 = scmp.ne.s32.totalorder %s3351_s30, %s3347_s29 }
  0x77   : > { %s3620_s27 = scalar_select %p37_p1, %s3355_s15, %s39_s12  }
  0x78   : > { %p3622_p0 = por %p47_p8, %p46_p3  ;;  %p4152_p2 = scmp.eq.s32.totalorder %s3478_s19, 0 }
  0x79   : > { %p349_p5 = scmp.eq.s32.totalorder %s3478_s19, 1  ;;  %p355_p7 = scmp.eq.s32.totalorder %s2597_s23, 1 }
  0x7a   : > { %p3628_p6 = por %p4152_p2, %p52_p13  ;;  %p3020_p9 = scmp.lt.s32.totalorder %s3359_s16, 2 }
  0x7b   : > { %s454_s13 = sand.u32 1, %s3355_s15   ;;  %p3635_p4 = por %p349_p5, %p46_p3 }
  0x7c   : > { %p3639_p10 = por %p355_p7, %p52_p13  ;;  %s2604_s24 = sshll.u32 %s454_s13, 3 }
  0x7d   : > { %s4154_s11 = scalar_select %p3635_p4, 1, 0 }
  0x7e   : > { %s4155_s17 = scalar_select %p3639_p10, 1, 0 }
  0x7f   : > { %s2605_s14 = sshll.u32 %s3359_s16, 7  ;;  %s4156_s0 = sld [smem:[#allocation16_spill]] }
  0x80   : > { %s458_s8 = scalar_lea.vmem [#allocation2], %s2604_s24  ;;  %p3653_p11 = pnand %p3020_p9, %p3622_p0 }
  0x81   : > { %s465_s23 = sshll.u32 %s458_s8, 4  ;;  %s455_s12 = scalar_lea.sflag [#allocation3], %s454_s13  ;;  %s3649_s23 = int_to_ptr.vmem [resolvable:$true] %s465_s23 }
  0x82   : > { %p3257_p1 = pneg %p3653_p11 }
  0x85   : > { %s3647_s18 = scalar_lea.hbm %s4156_s0, %s2605_s14  ;;  %s3260_s22 = scalar_lea.hbm %s4156_s0, 256 }
  0x86   : > { %s3255_s5 = scalar_lea.hbm %s3647_s18, 128  ;;  %p3261_p13 = scmp.lt.u32.totalorder %s3647_s18, %s4156_s0 }
  0x87   : > { %p3256_p12 = scmp.ne.s32.totalorder %s3647_s18, %s3255_s5  ;;  %p3262_p0 = scmp.lt.u32.totalorder %s3260_s22, %s3255_s5 }
  0x88   : > { %p3264_p5 = scmp.lt.u32.totalorder %s3255_s5, %s3647_s18 }
  0x89   : > { %p3258_p3 = pnand %p3257_p1, %p3256_p12  ;;  %p3263_p2 = por %p3262_p0, %p3261_p13 }
  0x8b   : > { %p3259_p8 = pneg %p3258_p3  ;;  %p3265_p7 = por %p3264_p5, %p3263_p2 }
  0x8d   : > { %p3266_p9 = pnand %p3265_p7, %p3259_p8 }
  0x8f   : > { %3269 = shalt.err (!%p3266_p9)
}
  0x90   : > { %s3270_s13 = scalar_lea.vmem %s3649_s23, 128  ;;  %s3367_s8 = smov [#allocation2]  }
  0x91   : > { %p3271_p12 = scmp.ne.s32.totalorder %s3649_s23, %s3270_s13  ;;  %s3275_s24 = sshll.u32 %s3367_s8, 4  ;;  %s3276_s24 = int_to_ptr.vmem [resolvable:$false] %s3275_s24 }
  0x92   : > { %s3277_s14 = scalar_lea.vmem %s3276_s24, 256  ;;  %p3278_p4 = scmp.lt.s32.totalorder %s3649_s23, %s3276_s24 }
  0x93   : > { %p3273_p3 = pnand %p3271_p12, %p3257_p1  ;;  %p3279_p13 = scmp.lt.s32.totalorder %s3277_s14, %s3270_s13 }
  0x95   : > { %p3274_p10 = pneg %p3273_p3  ;;  %p3280_p0 = por %p3279_p13, %p3278_p4 }
  0x97   : > { %p3281_p2 = pnand %p3280_p0, %p3274_p10 }
  0x99   : > { %3284 = shalt.err (!%p3281_p2)
}
  0x9a   : > { %3011 = dma.hbm_to_vmem [thread:$0]  (!%p3653_p11), %s3647_s18, 128, %s3649_s23, %s455_s12  }
  0x9b   : > { %p4158_p8 = scmp.ne.s32.totalorder %s4147_s20, 0 }
  0x9c   : > { %s3685_s5 = sand.u32 (!%p4158_p8), 1, %s3351_s30  }
  0x9d   : > { %474 = sbr.rel (%p4158_p8) target bundleno = 7903 (0x1edf), region = 76  ;;  %s4128_s22 = sshll.u32 (!%p4158_p8), %s3685_s5, 3 }
  0x9e   : > { %s477_s28 = scalar_lea.sflag (!%p4158_p8), [#allocation3], %s3685_s5  ;;  %s480_s25 = scalar_lea.vmem (!%p4158_p8), [#allocation2], %s4128_s22 }
  0xa4   : > { %3330 = dma.done.wait (%p3628_p6), %s477_s28, 128  }
  0xa5   : > { %3332 = vsyncadd (%p3628_p6), %s477_s28, 4294967168  ;;  %p4159_p4 = scmp.eq.s32.totalorder %s3478_s19, 0 }
  0xa7   : > { %3334 = dma.done.wait (%p4159_p4), [#allocation6], 64   ;;  %p4160_p10 = pmov %p4159_p4 }
  0xa8   : > { %p4161_p11 = pmov %p4159_p4 }
  0xa9   : > { %3336 = vsyncadd (%p4160_p10), [#allocation6], 4294967232 }
  0xaa   : > { %3338 = dma.done.wait (%p4161_p11), [#allocation9], 64   ;;  %p4162_p1 = pmov %p4159_p4 }
  0xab   : > { %vm545_vm0 = vcmask 261120   ;;  %v3703_v0 = vld [vmem:[%s480_s25] sm:$0xff]  ;;  %s4163_s3 = sld [smem:[#allocation19_spill]]  ;;  %v3368_v8 = vmov 0.0   ;;  %vm3369_vm1 = vmmov 0   ;;  %s4164_s1 = sld [smem:[#allocation17_spill]] }
  0xac   : > { %3340 = vsyncadd (%p4162_p1), [#allocation9], 4294967232  ;;  %v546_v1 = vsel %vm545_vm0, %v3703_v0, 0.0  ;;  %2775 = vmatprep.subr.bf16.mxu1 %v3368_v8  ;;  %2779 = vmatprep.mubr.msk.bf16.mxu1 %vm3369_vm1, %v3368_v8  ;;  %s4165_s2 = sld [smem:[#allocation18_spill]]  ;;  %s3370_s24 = smov 120   ;;  %vm638_vm2 = vcmask 64512  }
  0xad   : > { %547 = vadd.xlane.f32.xlu0 %v546_v1  ;;  %2789 = vmatprep.subr.bf16.mxu0 %v3368_v8  ;;  %s3371_s14 = smov 96   ;;  %s3372_s28 = smov 88   ;;  %vm702_vm3 = vcmask 1043456   ;;  %v747_v62 = vld [vmem:[%s4110_s4] sm:$0xf]  ;;  %vm1438_vm5 = vcmask 523264  }
  0xae   : > { %2791 = vmatprep.mubr.msk.bf16.mxu0 %vm3369_vm1, %v3368_v8  ;;  %s3373_s25 = smov 56   ;;  %s4134_s20 = smov 64   ;;  %v911_v63 = vsel %vm702_vm3, %v747_v62, 0  ;;  %v2622_v1 = vld [vmem:[%s4110_s4 + $0x4] sm:$0xf] }
  0xaf   : > { %s4135_s26 = smov 80   ;;  %s4133_s18 = smov 112  }
  0xb0   : > { %s4130_s8 = smov 48   ;;  %s4131_s23 = smov 104  }
  0xb1   : > { %v3077_v7 = vld [vmem:[%s4163_s3] sm:$0xff]   ;;  %v3078_v9 = vld [vmem:[%s4163_s3 + $0x8] sm:$0xff]   ;;  %s4132_s10 = smov 72   ;;  %s4129_s12 = smov 40  }
  0xb2   : > { %2776 = vmatpush3.bf16.msra.mxu1 %v3077_v7  ;;  %v2613_v14 = vld [vmem:[%s4164_s1] ss:$0 sm:$0xff]  ;;  %s4167_s22 = sld [smem:[#allocation22_spill]]  ;;  %s4177_s13 = sld [smem:[#allocation25_spill]] }
  0xb3   : > { %2777 = vmatprep.subr.bf16.mxu1 %v3368_v8  ;;  %v2614_v16 = vld [vmem:[%s4165_s2] ss:$0 sm:$0xff]  ;;  %p4180_p5 = scmp.ne.s32.totalorder %s4154_s11, 0 }
  0xb6   : > { %2778 = vmatpush3.bf16.msra.mxu1 %v3078_v9 }
  0xb7   : > { %2783 = vmatprep.subr.bf16.mxu1 %v3368_v8 }
 0x13a   : > { %v548_v2 = vpop.xlane.xlu0 %547 }
 0x13b   : > { %v550_v3 = vmul.f32 0.03125, %v548_v2  ;;  %v865_v2 = vsel %vm702_vm3, %v2622_v1, 0 }
 0x13d   : > { %v551_v4 = vsub.f32 %v3703_v0, %v550_v3 }
 0x13f   : > { %v552_v5 = vmul.f32 %v551_v4, %v551_v4 }
 0x141   : > { %v553_v6 = vsel %vm545_vm0, %v552_v5, 0.0 }
 0x142   : > { %554 = vadd.xlane.f32.xlu0 %v553_v6 }
 0x1cf   : > { %v555_v10 = vpop.xlane.xlu0 %554 }
 0x1d0   : > { %v556_v11 = vmul.f32 0.03125, %v555_v10 }
 0x1d2   : > { %v557_v12 = vadd.f32 1e-05, %v556_v11 }
 0x1d4   : > { %3093 = vrsqrt.f32 %v557_v12 }
 0x1de   : > { %v3094_v13 = vpop.eup %3093 }
 0x1df   : > { %v559_v15 = vmul.f32 %v3094_v13, %v551_v4 }
 0x1e1   : > { %v566_v17 = vmul.f32 %v2613_v14, %v559_v15 }
 0x1e3   : > { %v573_v18 = vadd.f32 %v2614_v16, %v566_v17 }
 0x1e5   : > { %v574_v19 = vpack.c.bf16 %v573_v18, %v573_v18 }
 0x1e7   : > { %2780 = vmatmul.mubr.msk.bf16.vlgmr.msra.gmra.mrb[0].mxu1 %vm545_vm0, %v574_v19 }
 0x1e8   : > { %2785 = vmatprep.mubr.msk.bf16.mxu1 %vm3369_vm1, %v3368_v8 }
 0x2ba   : > { %v628_v20 = vpop.f32.mrb[0].mxu1 }
 0x2bb   : > { %v3732_v21 = vpack.c.bf16 %v628_v20, %v628_v20  ;;  %v2781_v22 = vpop.f32.mrb[1].mxu1 }
 0x2bc   : > { %v631_v23 = vpop.f32.mrb[2].mxu1 }
 0x2bd   : > { %748 = vrot.lane.b32.xlu0 %v3732_v21, %s3370_s24  ;;  %636 = vrot.lane.b32.xlu1 %v3732_v21, %s3371_s14  ;;  %v2782_v24 = vpop.f32.mrb[3].mxu1 }
 0x2c1   : > { %750 = vrot.lane.b32.xlu1 %v3732_v21, %s3372_s28 }
 0x32f   : > { %v637_v25 = vpop.permute.xlu1 %636  ;;  %v749_v29 = vpop.permute.xlu0 %748 }
 0x330   : > { %v643_v26 = vsel %vm638_vm2, %v637_v25, 0 }
 0x331   : > { %2784 = vmatpush3.bf16.xpose.msra.mxu1 %v643_v26 }
 0x332   : > { %2795 = vmatprep.subr.bf16.mxu1 %v3368_v8 }
 0x333   : > { %v751_v27 = vpop.permute.xlu1 %750 }
 0x334   : > { %v756_v28 = vsel %vm638_vm2, %v751_v27, 0 }
 0x338   : > { %2786 = vmatmul.mubr.msk.bf16.vlgmr.msra.gmra.mrb[4].mxu1 %vm638_vm2, %v3732_v21 }
 0x339   : > { %2796 = vmatpush3.bf16.xpose.msra.mxu1 %v756_v28  ;;  %2797 = vmatprep.mubr.msk.bf16.mxu1 %vm3369_vm1, %v3368_v8 }
 0x33a   : > { %2807 = vmatprep.subr.bf16.mxu1 %v3368_v8 }
 0x340   : > { %2798 = vmatmul.mubr.msk.bf16.vlgmr.msra.gmra.mrb[8].mxu1 %vm638_vm2, %v749_v29 }
 0x341   : > { %2809 = vmatprep.mubr.msk.bf16.mxu1 %vm3369_vm1, %v3368_v8  ;;  %2808 = vmatpush3.bf16.msra.mxu1 %v865_v2 }
 0x342   : > { %2819 = vmatprep.subr.bf16.mxu1 %v3368_v8 }
 0x40b   : > { %v679_v30 = vpop.f32.mrb[4].mxu1 }
 0x40c   : > { %v2787_v31 = vpop.f32.mrb[5].mxu1  ;;  %v685_v32 = vsel %vm638_vm2, %v679_v30, -inf }
 0x40d   : > { %686 = vmax.xlane.f32.xlu1 %v685_v32  ;;  %v682_v33 = vpop.f32.mrb[6].mxu1 }
 0x40e   : > { %v2788_v34 = vpop.f32.mrb[7].mxu1 }
 0x413   : > { %v792_v35 = vpop.f32.mrb[8].mxu1 }
 0x414   : > { %v2799_v36 = vpop.f32.mrb[9].mxu1  ;;  %v798_v37 = vsel %vm638_vm2, %v792_v35, -inf }
 0x415   : > { %799 = vmax.xlane.f32.xlu0 %v798_v37  ;;  %v795_v38 = vpop.f32.mrb[10].mxu1 }
 0x416   : > { %v2800_v39 = vpop.f32.mrb[11].mxu1 }
 0x42b   : > { %810 = vrot.lane.b32.xlu0 %v3732_v21, %s3373_s25 }
 0x49a   : > { %v687_v40 = vpop.xlane.xlu1 %686 }
 0x49b   : > { %v688_v41 = vsub.f32 %v679_v30, %v687_v40 }
 0x49d   : > { %v689_v42 = vmul.f32 1.442695, %v688_v41 }
 0x49f   : > { %3095 = vpow2.f32 %v689_v42 }
 0x4a2   : > { %v800_v43 = vpop.xlane.xlu0 %799 }
 0x4a3   : > { %v801_v44 = vsub.f32 %v792_v35, %v800_v43 }
 0x4a5   : > { %v802_v45 = vmul.f32 1.442695, %v801_v44 }
 0x4a6   : > { %v811_v56 = vpop.permute.xlu0 %810 }
 0x4a7   : > { %3097 = vpow2.f32 %v802_v45  ;;  %v816_v58 = vsel %vm702_vm3, %v811_v56, 0 }
 0x4a9   : > { %v3096_v46 = vpop.eup %3095 }
 0x4aa   : > { %v691_v47 = vsel %vm638_vm2, %v3096_v46, 0.0 }
 0x4ab   : > { %692 = vadd.xlane.f32.xlu1 %v691_v47 }
 0x4b1   : > { %v3098_v48 = vpop.eup %3097 }
 0x4b2   : > { %v804_v49 = vsel %vm638_vm2, %v3098_v48, 0.0 }
 0x4b3   : > { %805 = vadd.xlane.f32.xlu1 %v804_v49 }
 0x4c4   : > { %697 = vrot.lane.b32.xlu1 %v3732_v21, %s4134_s20  ;;  %s4178_s20 = sshll.u32 %s3685_s5, 3 }
 0x4c8   : > { %955 = vrot.lane.b32.xlu1 %v3732_v21, %s4135_s26  ;;  %s4172_s26 = smov 72  }
 0x4cc   : > { %953 = vrot.lane.b32.xlu1 %v3732_v21, %s4133_s18  ;;  %s4168_s18 = sld [smem:[#allocation23_spill]] }
 0x538   : > { %v693_v50 = vpop.xlane.xlu1 %692 }
 0x539   : > { %3099 = vrcp.f32 %v693_v50 }
 0x540   : > { %v806_v51 = vpop.xlane.xlu1 %805 }
 0x541   : > { %3101 = vrcp.f32 %v806_v51 }
 0x543   : > { %v3100_v52 = vpop.eup %3099 }
 0x544   : > { %v698_v53 = vpop.permute.xlu1 %697  ;;  %v695_v54 = vmul.f32 %v3100_v52, %v3096_v46  ;;  %v2627_v46 = vld [vmem:[%s4110_s4 + $0x8] sm:$0xf] }
 0x545   : > { %v704_v55 = vsel %vm702_vm3, %v698_v53, 0  ;;  %v1070_v47 = vsel %vm702_vm3, %v2627_v46, 0  ;;  %v3083_v46 = vld [vmem:[%s4167_s22 + $0x10] sm:$0xff]  }
 0x546   : > { %2790 = vmatpush3.bf16.msra.mxu0 %v704_v55  ;;  %v696_v57 = vpack.c.bf16 %v695_v54, %v695_v54 }
 0x547   : > { %2801 = vmatprep.subr.bf16.mxu0 %v3368_v8 }
 0x548   : > { %v956_v9 = vpop.permute.xlu1 %955 }
 0x549   : > { %2792 = vmatmul.mubr.msk.bf16.vlgmr.msra.gmra.mrb[0].mxu0 %vm638_vm2, %v696_v57  ;;  %v961_v14 = vsel %vm638_vm2, %v956_v9, 0 }
 0x54a   : > { %2802 = vmatpush3.bf16.msra.mxu0 %v816_v58  ;;  %2803 = vmatprep.mubr.msk.bf16.mxu0 %vm3369_vm1, %v3368_v8 }
 0x54b   : > { %v3102_v59 = vpop.eup %3101  ;;  %2813 = vmatprep.subr.bf16.mxu0 %v3368_v8 }
 0x54c   : > { %v808_v60 = vmul.f32 %v3102_v59, %v3098_v48  ;;  %v954_v16 = vpop.permute.xlu1 %953 }
 0x54e   : > { %v809_v61 = vpack.c.bf16 %v808_v60, %v808_v60 }
 0x551   : > { %2804 = vmatmul.mubr.msk.bf16.vlgmr.msra.gmra.mrb[4].mxu0 %vm638_vm2, %v809_v61 }
 0x552   : > { %2815 = vmatprep.mubr.msk.bf16.mxu0 %vm3369_vm1, %v3368_v8  ;;  %2814 = vmatpush3.bf16.msra.mxu0 %v911_v63 }
 0x553   : > { %2825 = vmatprep.subr.bf16.mxu0 %v3368_v8 }
 0x61c   : > { %v740_v3 = vpop.f32.mrb[0].mxu0 }
 0x61d   : > { %v746_v4 = vpack.c.bf16 %v740_v3, %v740_v3  ;;  %v2793_v5 = vpop.f32.mrb[1].mxu0 }
 0x61e   : > { %v743_v6 = vpop.f32.mrb[2].mxu0 }
 0x61f   : > { %v2794_v7 = vpop.f32.mrb[3].mxu0  ;;  %2816 = vmatmul.mubr.msk.bf16.vlgmr.msra.gmra.mrb[8].mxu0 %vm638_vm2, %v746_v4 }
 0x620   : > { %2827 = vmatprep.mubr.msk.bf16.mxu0 %vm3369_vm1, %v3368_v8 }
 0x624   : > { %v852_v10 = vpop.f32.mrb[4].mxu0 }
 0x625   : > { %v858_v11 = vpack.c.bf16 %v852_v10, %v852_v10  ;;  %v2805_v12 = vpop.f32.mrb[5].mxu0 }
 0x626   : > { %v855_v13 = vpop.f32.mrb[6].mxu0 }
 0x627   : > { %v2806_v15 = vpop.f32.mrb[7].mxu0  ;;  %2810 = vmatmul.mubr.msk.bf16.vlgmr.msra.gmra.mrb[12].mxu1 %vm638_vm2, %v858_v11 }
 0x628   : > { %2820 = vmatpush3.bf16.xpose.msra.mxu1 %v961_v14  ;;  %2821 = vmatprep.mubr.msk.bf16.mxu1 %vm3369_vm1, %v3368_v8 }
 0x629   : > { %2831 = vmatprep.subr.bf16.mxu1 %v3368_v8 }
 0x62f   : > { %2822 = vmatmul.mubr.msk.bf16.vlgmr.msra.gmra.mrb[16].mxu1 %vm638_vm2, %v954_v16 }
 0x630   : > { %2833 = vmatprep.mubr.msk.bf16.mxu1 %vm3369_vm1, %v3368_v8  ;;  %2832 = vmatpush3.bf16.msra.mxu1 %v1070_v47  ;;  %v3084_v47 = vld [vmem:[%s4167_s22 + $0x18] sm:$0xff]  }
 0x631   : > { %2843 = vmatprep.subr.bf16.mxu1 %v3368_v8 }
 0x6f2   : > { %v947_v17 = vpop.f32.mrb[8].mxu0 }
 0x6f3   : > { %v2817_v18 = vpop.f32.mrb[9].mxu0 }
 0x6f4   : > { %v950_v19 = vpop.f32.mrb[10].mxu0 }
 0x6f5   : > { %v2818_v20 = vpop.f32.mrb[11].mxu0 }
 0x6fa   : > { %v901_v22 = vpop.f32.mrb[12].mxu1 }
 0x6fb   : > { %v3794_v23 = vadd.f32 %v947_v17, %v901_v22  ;;  %v2811_v24 = vpop.f32.mrb[13].mxu1  ;;  %v2633_v22 = vld [vmem:[#allocation5] ss:$0 sm:$0xff] }
 0x6fc   : > { %v904_v25 = vpop.f32.mrb[14].mxu1 }
 0x6fd   : > { %v2812_v26 = vpop.f32.mrb[15].mxu1 }
 0x702   : > { %v997_v27 = vpop.f32.mrb[16].mxu1 }
 0x703   : > { %v2823_v28 = vpop.f32.mrb[17].mxu1  ;;  %v1003_v29 = vsel %vm638_vm2, %v997_v27, -inf }
 0x704   : > { %1004 = vmax.xlane.f32.xlu1 %v1003_v29  ;;  %v1000_v30 = vpop.f32.mrb[18].mxu1 }
 0x705   : > { %v2824_v31 = vpop.f32.mrb[19].mxu1 }
 0x715   : > { %1015 = vrot.lane.b32.xlu1 %v3732_v21, %s4130_s8  ;;  %s2702_s8 = sshll.u32 %s3478_s19, 7  ;;  %s3381_s19 = smov [#allocation11]  }
 0x719   : > { %1113 = vrot.lane.b32.xlu1 %v3732_v21, %s4131_s23  ;;  %s4174_s23 = smov 48  }
 0x791   : > { %v1005_v32 = vpop.xlane.xlu1 %1004 }
 0x792   : > { %v1006_v33 = vsub.f32 %v997_v27, %v1005_v32 }
 0x794   : > { %v1007_v34 = vmul.f32 1.442695, %v1006_v33 }
 0x795   : > { %v1016_v35 = vpop.permute.xlu1 %1015 }
 0x796   : > { %3103 = vpow2.f32 %v1007_v34  ;;  %v1021_v36 = vsel %vm702_vm3, %v1016_v35, 0 }
 0x797   : > { %2826 = vmatpush3.bf16.msra.mxu0 %v1021_v36 }
 0x798   : > { %2837 = vmatprep.subr.bf16.mxu0 %v3368_v8 }
 0x799   : > { %v1114_v45 = vpop.permute.xlu1 %1113 }
 0x7a0   : > { %v3104_v37 = vpop.eup %3103 }
 0x7a1   : > { %v1009_v38 = vsel %vm638_vm2, %v3104_v37, 0.0 }
 0x7a2   : > { %1010 = vadd.xlane.f32.xlu0 %v1009_v38  ;;  %v2634_v38 = vld [vmem:[#allocation7] ss:$0 sm:$0xff] }
 0x7b8   : > { %1115 = vrot.lane.b32.xlu0 %v3732_v21, %s4132_s10  ;;  %s4173_s10 = smov 104  }
 0x82f   : > { %v1011_v39 = vpop.xlane.xlu0 %1010 }
 0x830   : > { %3105 = vrcp.f32 %v1011_v39 }
 0x833   : > { %v1116_v42 = vpop.permute.xlu0 %1115 }
 0x834   : > { %v1121_v44 = vsel %vm638_vm2, %v1116_v42, 0 }
 0x83a   : > { %v3106_v40 = vpop.eup %3105 }
 0x83b   : > { %v1013_v41 = vmul.f32 %v3106_v40, %v3104_v37  ;;  %v2635_v40 = vld [vmem:[#allocation8] ss:$0 sm:$0xff] }
 0x83d   : > { %v1014_v43 = vpack.c.bf16 %v1013_v41, %v1013_v41 }
 0x83f   : > { %2828 = vmatmul.mubr.msk.bf16.vlgmr.msra.gmra.mrb[12].mxu0 %vm638_vm2, %v1014_v43 }
 0x840   : > { %2838 = vmatpush3.bf16.xpose.msra.mxu0 %v1121_v44  ;;  %2839 = vmatprep.mubr.msk.bf16.mxu0 %vm3369_vm1, %v3368_v8  ;;  %v3081_v44 = vld [vmem:[%s4167_s22] sm:$0xff]  }
 0x841   : > { %2849 = vmatprep.subr.bf16.mxu0 %v3368_v8 }
 0x847   : > { %2840 = vmatmul.mubr.msk.bf16.vlgmr.msra.gmra.mrb[16].mxu0 %vm638_vm2, %v1114_v45  ;;  %v3082_v45 = vld [vmem:[%s4167_s22 + $0x8] sm:$0xff]  }
 0x848   : > { %2851 = vmatprep.mubr.msk.bf16.mxu0 %vm3369_vm1, %v3368_v8 }
 0x912   : > { %v1057_v48 = vpop.f32.mrb[12].mxu0 }
 0x913   : > { %v1063_v49 = vpack.c.bf16 %v1057_v48, %v1057_v48  ;;  %v2829_v50 = vpop.f32.mrb[13].mxu0  ;;  %v2636_v48 = vld [vmem:[#allocation10] ss:$0 sm:$0xff] }
 0x914   : > { %v1060_v51 = vpop.f32.mrb[14].mxu0 }
 0x915   : > { %v2830_v52 = vpop.f32.mrb[15].mxu0  ;;  %2834 = vmatmul.mubr.msk.bf16.vlgmr.msra.gmra.mrb[20].mxu1 %vm638_vm2, %v1063_v49 }
 0x916   : > { %2845 = vmatprep.mubr.msk.bf16.mxu1 %vm3369_vm1, %v3368_v8 }
 0x91a   : > { %v1157_v53 = vpop.f32.mrb[16].mxu0 }
 0x91b   : > { %v2841_v54 = vpop.f32.mrb[17].mxu0  ;;  %v1163_v55 = vsel %vm638_vm2, %v1157_v53, -inf }
 0x91c   : > { %1164 = vmax.xlane.f32.xlu1 %v1163_v55  ;;  %v1160_v56 = vpop.f32.mrb[18].mxu0 }
 0x91d   : > { %v2842_v57 = vpop.f32.mrb[19].mxu0 }
 0x9a9   : > { %v1165_v58 = vpop.xlane.xlu1 %1164 }
 0x9aa   : > { %v1166_v59 = vsub.f32 %v1157_v53, %v1165_v58 }
 0x9ac   : > { %v1167_v60 = vmul.f32 1.442695, %v1166_v59 }
 0x9ae   : > { %3107 = vpow2.f32 %v1167_v60 }
 0x9b8   : > { %v3108_v61 = vpop.eup %3107 }
 0x9b9   : > { %v1169_v62 = vsel %vm638_vm2, %v3108_v61, 0.0 }
 0x9ba   : > { %1170 = vadd.xlane.f32.xlu0 %v1169_v62 }
 0x9d0   : > { %1175 = vrot.lane.b32.xlu0 %v3732_v21, %s4129_s12  ;;  %v2631_v21 = vld [vmem:[%s4110_s4 + $0xc] sm:$0xf]  ;;  %s4166_s12 = sld [smem:[#allocation21_spill]] }
 0x9d1   : > { %v1230_v12 = vsel %vm702_vm3, %v2631_v21, 0 }
 0x9d2   : > { %2850 = vmatpush3.bf16.msra.mxu0 %v1230_v12 }
 0x9d3   : > { %2863 = vmatprep.subr.bf16.mxu0 %v3368_v8 }
 0x9d6   : > { %v3079_v33 = vld [vmem:[%s4166_s12] sm:$0xff]  }
 0x9e8   : > { %v1106_v63 = vpop.f32.mrb[20].mxu1 }
 0x9e9   : > { %v1112_v1 = vadd.f32 %v1106_v63, %v3794_v23  ;;  %v2835_v2 = vpop.f32.mrb[21].mxu1 }
 0x9ea   : > { %v1109_v3 = vpop.f32.mrb[22].mxu1 }
 0x9eb   : > { %v2836_v4 = vpop.f32.mrb[23].mxu1 }
 0xa47   : > { %v1171_v5 = vpop.xlane.xlu0 %1170 }
 0xa48   : > { %3109 = vrcp.f32 %v1171_v5 }
 0xa4b   : > { %v1176_v6 = vpop.permute.xlu0 %1175 }
 0xa4c   : > { %v1181_v7 = vsel %vm702_vm3, %v1176_v6, 0 }
 0xa4d   : > { %2844 = vmatpush3.bf16.msra.mxu1 %v1181_v7 }
 0xa4e   : > { %2855 = vmatprep.subr.bf16.mxu1 %v3368_v8 }
 0xa52   : > { %v3110_v9 = vpop.eup %3109 }
 0xa53   : > { %v1173_v10 = vmul.f32 %v3110_v9, %v3108_v61 }
 0xa55   : > { %v1174_v11 = vpack.c.bf16 %v1173_v10, %v1173_v10 }
 0xa57   : > { %2846 = vmatmul.mubr.msk.bf16.vlgmr.msra.gmra.mrb[24].mxu1 %vm638_vm2, %v1174_v11 }
 0xa58   : > { %2859 = vmatprep.mubr.msk.bf16.mxu1 %vm3369_vm1, %v3368_v8  ;;  %2856 = vmatpush3.bf16.msra.mxu1 %v3079_v33 }
 0xa59   : > { %2857 = vmatprep.subr.bf16.mxu1 %v3368_v8 }
 0xb2a   : > { %v1217_v13 = vpop.f32.mrb[24].mxu1 }
 0xb2b   : > { %v1223_v14 = vpack.c.bf16 %v1217_v13, %v1217_v13  ;;  %v2847_v15 = vpop.f32.mrb[25].mxu1 }
 0xb2c   : > { %v1220_v16 = vpop.f32.mrb[26].mxu1 }
 0xb2d   : > { %v2848_v17 = vpop.f32.mrb[27].mxu1  ;;  %2852 = vmatmul.mubr.msk.bf16.vlgmr.msra.gmra.mrb[20].mxu0 %vm638_vm2, %v1223_v14 }
 0xb2e   : > { %2871 = vmatprep.mubr.msk.bf16.mxu0 %vm3369_vm1, %v3368_v8  ;;  %2864 = vmatpush3.bf16.msra.mxu0 %v3081_v44 }
 0xb2f   : > { %2865 = vmatprep.subr.bf16.mxu0 %v3368_v8 }
 0xb32   : > { %2866 = vmatpush3.bf16.msra.mxu0 %v3082_v45 }
 0xb33   : > { %2867 = vmatprep.subr.bf16.mxu0 %v3368_v8 }
 0xb36   : > { %2868 = vmatpush3.bf16.msra.mxu0 %v3083_v46 }
 0xb37   : > { %2869 = vmatprep.subr.bf16.mxu0 %v3368_v8 }
 0xb3a   : > { %2870 = vmatpush3.bf16.msra.mxu0 %v3084_v47 }
 0xb3b   : > { %2889 = vmatprep.subr.bf16.mxu0 %v3368_v8 }
 0xc00   : > { %v1266_v18 = vpop.f32.mrb[20].mxu0 }
 0xc01   : > { %v1272_v19 = vadd.f32 %v1266_v18, %v1112_v1  ;;  %v2853_v20 = vpop.f32.mrb[21].mxu0  ;;  %v2645_v18 = vld [vmem:[%s4168_s18] ss:$0 sm:$0xff] }
 0xc02   : > { %v1269_v23 = vpop.f32.mrb[22].mxu0 }
 0xc03   : > { %v1273_v24 = vadd.f32 %v1272_v19, %v3703_v0  ;;  %v2854_v25 = vpop.f32.mrb[23].mxu0  ;;  %v3080_v0 = vld [vmem:[%s4166_s12 + $0x8] sm:$0xff]  }
 0xc04   : > { %2858 = vmatpush3.bf16.msra.mxu1 %v3080_v0 }
 0xc05   : > { %v3841_v26 = vadd.f32 %v2633_v22, %v1273_v24  ;;  %2875 = vmatprep.subr.bf16.mxu1 %v3368_v8 }
 0xc07   : > { %v1284_v27 = vsel %vm545_vm0, %v3841_v26, 0.0 }
 0xc08   : > { %1285 = vadd.xlane.f32.xlu1 %v1284_v27 }
 0xc95   : > { %v1286_v28 = vpop.xlane.xlu1 %1285 }
 0xc96   : > { %v1287_v29 = vmul.f32 0.03125, %v1286_v28 }
 0xc98   : > { %v1288_v30 = vsub.f32 %v3841_v26, %v1287_v29 }
 0xc9a   : > { %v1289_v31 = vmul.f32 %v1288_v30, %v1288_v30 }
 0xc9c   : > { %v1290_v32 = vsel %vm545_vm0, %v1289_v31, 0.0 }
 0xc9d   : > { %1291 = vadd.xlane.f32.xlu1 %v1290_v32  ;;  %v3086_v32 = vld [vmem:[%s4163_s3 + $0x18] sm:$0xff]  }
 0xd2a   : > { %v1292_v34 = vpop.xlane.xlu1 %1291 }
 0xd2b   : > { %v1293_v35 = vmul.f32 0.03125, %v1292_v34 }
 0xd2d   : > { %v1294_v36 = vadd.f32 1e-05, %v1293_v35 }
 0xd2f   : > { %3111 = vrsqrt.f32 %v1294_v36  ;;  %v2648_v36 = vld [vmem:[%s4164_s1 + $0x1] ss:$0 sm:$0xff] }
 0xd39   : > { %v3112_v37 = vpop.eup %3111 }
 0xd3a   : > { %v1296_v39 = vmul.f32 %v3112_v37, %v1288_v30 }
 0xd3c   : > { %v1303_v41 = vmul.f32 %v2634_v38, %v1296_v39  ;;  %v2649_v38 = vld [vmem:[%s4165_s2 + $0x1] ss:$0 sm:$0xff]  ;;  %s4179_s2 = sld [smem:[#allocation26_spill]] }
 0xd3e   : > { %v1310_v42 = vadd.f32 %v2635_v40, %v1303_v41 }
 0xd40   : > { %v1311_v43 = vpack.c.bf16 %v1310_v42, %v1310_v42 }
 0xd42   : > { %2860 = vmatmul.mubr.msk.bf16.vlgmr.msra.gmra.mrb[28].mxu1 %vm545_vm0, %v1311_v43 }
 0xd43   : > { %2879 = vmatprep.mubr.msk.bf16.mxu1 %vm3369_vm1, %v3368_v8 }
 0xe15   : > { %v1372_v49 = vpop.f32.mrb[28].mxu1 }
 0xe16   : > { %v1373_v50 = vadd.f32 %v2636_v48, %v1372_v49  ;;  %v2861_v51 = vpop.f32.mrb[29].mxu1 }
 0xe17   : > { %v1375_v52 = vpop.f32.mrb[30].mxu1 }
 0xe18   : > { %v1379_v53 = vmul.f32 0.70710677, %v1373_v50  ;;  %v2862_v54 = vpop.f32.mrb[31].mxu1  ;;  %v1378_v13 = vmul.f32 0.5, %v1373_v50 }
 0xe1a   : > { %v1380_v55 = vand.u32 2147483647, %v1379_v53  ;;  %vm1400_vm4 = vcmp.lt.f32.partialorder %v1379_v53, 0.0 }
 0xe1c   : > { %v1381_v56 = vmul.f32 0.3275911, %v1380_v55  ;;  %v1394_v58 = vsub.f32 0.0, %v1380_v55 }
 0xe1e   : > { %v1382_v57 = vadd.f32 1.0, %v1381_v56  ;;  %v1395_v60 = vmul.f32 %v1394_v58, %v1380_v55 }
 0xe20   : > { %3113 = vrcp.f32 %v1382_v57  ;;  %v1396_v63 = vmul.f32 1.442695, %v1395_v60 }
 0xe22   : > { %3115 = vpow2.f32 %v1396_v63 }
 0xe2a   : > { %v3114_v59 = vpop.eup %3113 }
 0xe2b   : > { %v1385_v61 = vmul.f32 1.0614054, %v3114_v59 }
 0xe2c   : > { %v3116_v9 = vpop.eup %3115 }
 0xe2d   : > { %v1386_v62 = vadd.f32 -1.4531521, %v1385_v61 }
 0xe2f   : > { %v1387_v1 = vmul.f32 %v3114_v59, %v1386_v62 }
 0xe31   : > { %v1388_v2 = vadd.f32 1.4214138, %v1387_v1 }
 0xe33   : > { %v1389_v3 = vmul.f32 %v3114_v59, %v1388_v2 }
 0xe35   : > { %v1390_v4 = vadd.f32 -0.28449672, %v1389_v3 }
 0xe37   : > { %v1391_v5 = vmul.f32 %v3114_v59, %v1390_v4 }
 0xe39   : > { %v1392_v6 = vadd.f32 0.2548296, %v1391_v5 }
 0xe3b   : > { %v1393_v7 = vmul.f32 %v3114_v59, %v1392_v6 }
 0xe3d   : > { %v1398_v10 = vmul.f32 %v3116_v9, %v1393_v7 }
 0xe3f   : > { %v1399_v11 = vsub.f32 1.0, %v1398_v10 }
 0xe41   : > { %v1401_v21 = vsub.f32 0.0, %v1399_v11 }
 0xe43   : > { %v1402_v12 = vsel %vm1400_vm4, %v1401_v21, %v1399_v11 }
 0xe44   : > { %v1403_v14 = vadd.f32 1.0, %v1402_v12 }
 0xe46   : > { %v1404_v15 = vmul.f32 %v1403_v14, %v1378_v13 }
 0xe48   : > { %v1405_v16 = vpack.c.bf16 %v1404_v15, %v1404_v15 }
 0xe4a   : > { %2872 = vmatmul.mubr.msk.bf16.vlgmr.msra.gmra.mrb[24].mxu0 %vm1438_vm5, %v1405_v16 }
 0xe4b   : > { %2891 = vmatprep.mubr.msk.bf16.mxu0 %vm3369_vm1, %v3368_v8 }
 0xf1d   : > { %v1476_v17 = vpop.f32.mrb[24].mxu0 }
 0xf1e   : > { %v1482_v19 = vadd.f32 %v1476_v17, %v3841_v26  ;;  %v2873_v20 = vpop.f32.mrb[25].mxu0  ;;  %v3085_v26 = vld [vmem:[%s4163_s3 + $0x10] sm:$0xff]   ;;  %s4061_s3 = scalar_lea.hbm %s4179_s2, %s2702_s8 }
 0xf1f   : > { %v1479_v22 = vpop.f32.mrb[26].mxu0  ;;  %2876 = vmatpush3.bf16.msra.mxu1 %v3085_v26 }
 0xf20   : > { %v3881_v23 = vadd.f32 %v2645_v18, %v1482_v19  ;;  %v2874_v24 = vpop.f32.mrb[27].mxu0  ;;  %2877 = vmatprep.subr.bf16.mxu1 %v3368_v8  ;;  %v2659_v22 = vld [vmem:[%s4110_s4 + $0x10] sm:$0xf] }
 0xf21   : > { %v1859_v24 = vsel %vm702_vm3, %v2659_v22, 0 }
 0xf22   : > { %v1495_v25 = vsel %vm545_vm0, %v3881_v23, 0.0 }
 0xf23   : > { %1496 = vadd.xlane.f32.xlu1 %v1495_v25  ;;  %2878 = vmatpush3.bf16.msra.mxu1 %v3086_v32  ;;  %v2662_v25 = vld [vmem:[%s4110_s4 + $0x14] sm:$0xf] }
 0xf24   : > { %2883 = vmatprep.subr.bf16.mxu1 %v3368_v8 }
 0xfb0   : > { %v1497_v27 = vpop.xlane.xlu1 %1496 }
 0xfb1   : > { %v1498_v28 = vmul.f32 0.03125, %v1497_v27  ;;  %v1813_v27 = vsel %vm702_vm3, %v2662_v25, 0 }
 0xfb3   : > { %v1499_v29 = vsub.f32 %v3881_v23, %v1498_v28 }
 0xfb5   : > { %v1500_v30 = vmul.f32 %v1499_v29, %v1499_v29 }
 0xfb7   : > { %v1501_v31 = vsel %vm545_vm0, %v1500_v30, 0.0 }
 0xfb8   : > { %1502 = vadd.xlane.f32.xlu1 %v1501_v31 }
0x1045   : > { %v1503_v33 = vpop.xlane.xlu1 %1502 }
0x1046   : > { %v1504_v0 = vmul.f32 0.03125, %v1503_v33 }
0x1048   : > { %v1505_v34 = vadd.f32 1e-05, %v1504_v0 }
0x104a   : > { %3117 = vrsqrt.f32 %v1505_v34 }
0x1054   : > { %v3118_v35 = vpop.eup %3117 }
0x1055   : > { %v1507_v37 = vmul.f32 %v3118_v35, %v1499_v29 }
0x1057   : > { %v1514_v39 = vmul.f32 %v2648_v36, %v1507_v37 }
0x1059   : > { %v1521_v40 = vadd.f32 %v2649_v38, %v1514_v39 }
0x105b   : > { %v1522_v41 = vpack.c.bf16 %v1521_v40, %v1521_v40 }
0x105d   : > { %2880 = vmatmul.mubr.msk.bf16.vlgmr.msra.gmra.mrb[32].mxu1 %vm545_vm0, %v1522_v41 }
0x105e   : > { %2885 = vmatprep.mubr.msk.bf16.mxu1 %vm3369_vm1, %v3368_v8 }
0x1130   : > { %v1577_v42 = vpop.f32.mrb[32].mxu1 }
0x1131   : > { %v3904_v43 = vpack.c.bf16 %v1577_v42, %v1577_v42  ;;  %v2881_v44 = vpop.f32.mrb[33].mxu1 }
0x1132   : > { %v1580_v45 = vpop.f32.mrb[34].mxu1 }
0x1133   : > { %1698 = vrot.lane.b32.xlu0 %v3904_v43, %s3372_s28  ;;  %1585 = vrot.lane.b32.xlu1 %v3904_v43, %s3371_s14  ;;  %v2882_v46 = vpop.f32.mrb[35].mxu1  ;;  %s4170_s14 = smov 64   ;;  %s4171_s28 = smov 112  }
0x1137   : > { %1696 = vrot.lane.b32.xlu0 %v3904_v43, %s3370_s24  ;;  %s4169_s24 = smov 80  }
0x11a5   : > { %v1586_v47 = vpop.permute.xlu1 %1585  ;;  %v1699_v49 = vpop.permute.xlu0 %1698 }
0x11a6   : > { %v1591_v48 = vsel %vm638_vm2, %v1586_v47, 0  ;;  %v1704_v50 = vsel %vm638_vm2, %v1699_v49, 0 }
0x11a7   : > { %2884 = vmatpush3.bf16.xpose.msra.mxu1 %v1591_v48 }
0x11a8   : > { %2895 = vmatprep.subr.bf16.mxu1 %v3368_v8 }
0x11a9   : > { %v1697_v51 = vpop.permute.xlu0 %1696 }
0x11ae   : > { %2886 = vmatmul.mubr.msk.bf16.vlgmr.msra.gmra.mrb[36].mxu1 %vm638_vm2, %v3904_v43 }
0x11af   : > { %2896 = vmatpush3.bf16.xpose.msra.mxu1 %v1704_v50  ;;  %2897 = vmatprep.mubr.msk.bf16.mxu1 %vm3369_vm1, %v3368_v8 }
0x11b0   : > { %2907 = vmatprep.subr.bf16.mxu1 %v3368_v8 }
0x11b6   : > { %2898 = vmatmul.mubr.msk.bf16.vlgmr.msra.gmra.mrb[40].mxu1 %vm638_vm2, %v1697_v51 }
0x11b7   : > { %2909 = vmatprep.mubr.msk.bf16.mxu1 %vm3369_vm1, %v3368_v8  ;;  %2908 = vmatpush3.bf16.msra.mxu1 %v1813_v27 }
0x11b8   : > { %2919 = vmatprep.subr.bf16.mxu1 %v3368_v8 }
0x1281   : > { %v1627_v52 = vpop.f32.mrb[36].mxu1 }
0x1282   : > { %v2887_v53 = vpop.f32.mrb[37].mxu1  ;;  %v1633_v54 = vsel %vm638_vm2, %v1627_v52, -inf }
0x1283   : > { %1634 = vmax.xlane.f32.xlu0 %v1633_v54  ;;  %v1630_v55 = vpop.f32.mrb[38].mxu1 }
0x1284   : > { %v2888_v56 = vpop.f32.mrb[39].mxu1 }
0x1289   : > { %v1740_v57 = vpop.f32.mrb[40].mxu1 }
0x128a   : > { %v2899_v58 = vpop.f32.mrb[41].mxu1  ;;  %v1746_v59 = vsel %vm638_vm2, %v1740_v57, -inf }
0x128b   : > { %1747 = vmax.xlane.f32.xlu1 %v1746_v59  ;;  %v1743_v60 = vpop.f32.mrb[42].mxu1 }
0x128c   : > { %v2900_v61 = vpop.f32.mrb[43].mxu1 }
0x129c   : > { %1758 = vrot.lane.b32.xlu1 %v3904_v43, %s3373_s25 }
0x12a0   : > { %1903 = vrot.lane.b32.xlu1 %v3904_v43, %s4169_s24 }
0x1310   : > { %v1635_v62 = vpop.xlane.xlu0 %1634 }
0x1311   : > { %v1636_v63 = vsub.f32 %v1627_v52, %v1635_v62 }
0x1313   : > { %v1637_v1 = vmul.f32 1.442695, %v1636_v63 }
0x1315   : > { %3119 = vpow2.f32 %v1637_v1 }
0x1318   : > { %v1748_v2 = vpop.xlane.xlu1 %1747 }
0x1319   : > { %v1749_v3 = vsub.f32 %v1740_v57, %v1748_v2 }
0x131b   : > { %v1750_v4 = vmul.f32 1.442695, %v1749_v3 }
0x131c   : > { %v1759_v15 = vpop.permute.xlu1 %1758 }
0x131d   : > { %3121 = vpow2.f32 %v1750_v4  ;;  %v1764_v17 = vsel %vm702_vm3, %v1759_v15, 0 }
0x131f   : > { %v3120_v5 = vpop.eup %3119 }
0x1320   : > { %v1639_v6 = vsel %vm638_vm2, %v3120_v5, 0.0  ;;  %v1904_v32 = vpop.permute.xlu1 %1903 }
0x1321   : > { %1640 = vadd.xlane.f32.xlu0 %v1639_v6  ;;  %v1909_v36 = vsel %vm638_vm2, %v1904_v32, 0 }
0x1327   : > { %v3122_v7 = vpop.eup %3121 }
0x1328   : > { %v1752_v9 = vsel %vm638_vm2, %v3122_v7, 0.0 }
0x1329   : > { %1753 = vadd.xlane.f32.xlu0 %v1752_v9 }
0x133f   : > { %1645 = vrot.lane.b32.xlu0 %v3904_v43, %s4170_s14  ;;  %s4176_s14 = sld [smem:[#allocation24_spill]] }
0x1343   : > { %1901 = vrot.lane.b32.xlu0 %v3904_v43, %s4171_s28  ;;  %s4175_s28 = smov 40  }
0x13ae   : > { %v1641_v10 = vpop.xlane.xlu0 %1640 }
0x13af   : > { %3123 = vrcp.f32 %v1641_v10 }
0x13b6   : > { %v1754_v11 = vpop.xlane.xlu0 %1753 }
0x13b7   : > { %3125 = vrcp.f32 %v1754_v11 }
0x13b9   : > { %v3124_v21 = vpop.eup %3123 }
0x13ba   : > { %v1643_v12 = vmul.f32 %v3124_v21, %v3120_v5  ;;  %v1646_v13 = vpop.permute.xlu0 %1645  ;;  %v2667_v5 = vld [vmem:[%s4110_s4 + $0x18] sm:$0xf] }
0x13bb   : > { %v1651_v14 = vsel %vm702_vm3, %v1646_v13, 0  ;;  %v2018_v6 = vsel %vm702_vm3, %v2667_v5, 0  ;;  %v3091_v5 = vld [vmem:[%s4167_s22 + $0x30] sm:$0xff]  }
0x13bc   : > { %2890 = vmatpush3.bf16.msra.mxu0 %v1651_v14  ;;  %v1644_v16 = vpack.c.bf16 %v1643_v12, %v1643_v12 }
0x13bd   : > { %2901 = vmatprep.subr.bf16.mxu0 %v3368_v8 }
0x13be   : > { %v1902_v38 = vpop.permute.xlu0 %1901 }
0x13bf   : > { %2892 = vmatmul.mubr.msk.bf16.vlgmr.msra.gmra.mrb[28].mxu0 %vm638_vm2, %v1644_v16 }
0x13c0   : > { %2902 = vmatpush3.bf16.msra.mxu0 %v1764_v17  ;;  %2903 = vmatprep.mubr.msk.bf16.mxu0 %vm3369_vm1, %v3368_v8 }
0x13c1   : > { %v3126_v18 = vpop.eup %3125  ;;  %2913 = vmatprep.subr.bf16.mxu0 %v3368_v8 }
0x13c2   : > { %v1756_v19 = vmul.f32 %v3126_v18, %v3122_v7 }
0x13c4   : > { %v1757_v20 = vpack.c.bf16 %v1756_v19, %v1756_v19 }
0x13c7   : > { %2904 = vmatmul.mubr.msk.bf16.vlgmr.msra.gmra.mrb[32].mxu0 %vm638_vm2, %v1757_v20 }
0x13c8   : > { %2915 = vmatprep.mubr.msk.bf16.mxu0 %vm3369_vm1, %v3368_v8  ;;  %2914 = vmatpush3.bf16.msra.mxu0 %v1859_v24 }
0x13c9   : > { %2925 = vmatprep.subr.bf16.mxu0 %v3368_v8 }
0x1492   : > { %v1687_v28 = vpop.f32.mrb[28].mxu0 }
0x1493   : > { %v1693_v29 = vpack.c.bf16 %v1687_v28, %v1687_v28  ;;  %v2893_v30 = vpop.f32.mrb[29].mxu0 }
0x1494   : > { %v1690_v31 = vpop.f32.mrb[30].mxu0 }
0x1495   : > { %v2894_v26 = vpop.f32.mrb[31].mxu0  ;;  %2916 = vmatmul.mubr.msk.bf16.vlgmr.msra.gmra.mrb[36].mxu0 %vm638_vm2, %v1693_v29 }
0x1496   : > { %2927 = vmatprep.mubr.msk.bf16.mxu0 %vm3369_vm1, %v3368_v8 }
0x149a   : > { %v1800_v33 = vpop.f32.mrb[32].mxu0 }
0x149b   : > { %v1806_v0 = vpack.c.bf16 %v1800_v33, %v1800_v33  ;;  %v2905_v34 = vpop.f32.mrb[33].mxu0 }
0x149c   : > { %v1803_v35 = vpop.f32.mrb[34].mxu0 }
0x149d   : > { %v2906_v37 = vpop.f32.mrb[35].mxu0  ;;  %2910 = vmatmul.mubr.msk.bf16.vlgmr.msra.gmra.mrb[44].mxu1 %vm638_vm2, %v1806_v0  ;;  %v2671_v0 = vld [vmem:[%s4110_s4 + $0x1c] sm:$0xf] }
0x149e   : > { %2920 = vmatpush3.bf16.xpose.msra.mxu1 %v1909_v36  ;;  %2921 = vmatprep.mubr.msk.bf16.mxu1 %vm3369_vm1, %v3368_v8  ;;  %v2178_v34 = vsel %vm702_vm3, %v2671_v0, 0 }
0x149f   : > { %2931 = vmatprep.subr.bf16.mxu1 %v3368_v8 }
0x14a5   : > { %2922 = vmatmul.mubr.msk.bf16.vlgmr.msra.gmra.mrb[48].mxu1 %vm638_vm2, %v1902_v38 }
0x14a6   : > { %2933 = vmatprep.mubr.msk.bf16.mxu1 %vm3369_vm1, %v3368_v8  ;;  %2932 = vmatpush3.bf16.msra.mxu1 %v2018_v6  ;;  %v3092_v6 = vld [vmem:[%s4167_s22 + $0x38] sm:$0xff]  }
0x14a7   : > { %2943 = vmatprep.subr.bf16.mxu1 %v3368_v8 }
0x1568   : > { %v1895_v39 = vpop.f32.mrb[36].mxu0 }
0x1569   : > { %v2917_v40 = vpop.f32.mrb[37].mxu0 }
0x156a   : > { %v1898_v41 = vpop.f32.mrb[38].mxu0 }
0x156b   : > { %v2918_v42 = vpop.f32.mrb[39].mxu0 }
0x1570   : > { %v1849_v44 = vpop.f32.mrb[44].mxu1 }
0x1571   : > { %v3966_v45 = vadd.f32 %v1895_v39, %v1849_v44  ;;  %v2911_v46 = vpop.f32.mrb[45].mxu1  ;;  %v2673_v44 = vld [vmem:[#allocation5 + $0x1] ss:$0 sm:$0xff] }
0x1572   : > { %v1852_v47 = vpop.f32.mrb[46].mxu1 }
0x1573   : > { %v2912_v48 = vpop.f32.mrb[47].mxu1 }
0x1578   : > { %v1945_v49 = vpop.f32.mrb[48].mxu1 }
0x1579   : > { %v2923_v50 = vpop.f32.mrb[49].mxu1  ;;  %v1951_v51 = vsel %vm638_vm2, %v1945_v49, -inf }
0x157a   : > { %1952 = vmax.xlane.f32.xlu1 %v1951_v51  ;;  %v1948_v52 = vpop.f32.mrb[50].mxu1 }
0x157b   : > { %v2924_v53 = vpop.f32.mrb[51].mxu1 }
0x158b   : > { %2063 = vrot.lane.b32.xlu1 %v3904_v43, %s4172_s26  ;;  %s540_s26 = scalar_lea.vmem [#allocation11], %s4178_s20 }
0x158f   : > { %2061 = vrot.lane.b32.xlu1 %v3904_v43, %s4173_s10  ;;  %s2489_s10 = sshll.u32 %s540_s26, 4  ;;  %s4063_s10 = int_to_ptr.vmem [resolvable:$true] %s2489_s10 }
0x1590   : > { %s3285_s24 = scalar_lea.vmem %s4063_s10, 128 }
0x1591   : > { %p3286_p6 = scmp.ne.s32.totalorder %s4063_s10, %s3285_s24 }
0x1593   : > { %p3287_p7 = pnand %p3286_p6, %p4180_p5 }
0x1595   : > { %p3288_p9 = pneg %p3287_p7 }
0x1607   : > { %v1953_v54 = vpop.xlane.xlu1 %1952 }
0x1608   : > { %v1954_v55 = vsub.f32 %v1945_v49, %v1953_v54 }
0x160a   : > { %v1955_v56 = vmul.f32 1.442695, %v1954_v55  ;;  %v3087_v55 = vld [vmem:[%s4166_s12 + $0x10] sm:$0xff]  }
0x160b   : > { %v2064_v1 = vpop.permute.xlu1 %2063 }
0x160c   : > { %3127 = vpow2.f32 %v1955_v56  ;;  %v2069_v3 = vsel %vm638_vm2, %v2064_v1, 0 }
0x160f   : > { %v2062_v4 = vpop.permute.xlu1 %2061 }
0x1616   : > { %v3128_v57 = vpop.eup %3127 }
0x1617   : > { %v1957_v58 = vsel %vm638_vm2, %v3128_v57, 0.0 }
0x1618   : > { %1958 = vadd.xlane.f32.xlu0 %v1957_v58 }
0x162e   : > { %1963 = vrot.lane.b32.xlu0 %v3904_v43, %s4174_s23  ;;  %s2476_s23 = scalar_lea.sflag [#allocation4], %s3685_s5 }
0x16a5   : > { %v1959_v59 = vpop.xlane.xlu0 %1958 }
0x16a6   : > { %3129 = vrcp.f32 %v1959_v59 }
0x16a9   : > { %v1964_v60 = vpop.permute.xlu0 %1963 }
0x16aa   : > { %v1969_v61 = vsel %vm702_vm3, %v1964_v60, 0  ;;  %v2674_v60 = vld [vmem:[#allocation7 + $0x1] ss:$0 sm:$0xff] }
0x16ab   : > { %2926 = vmatpush3.bf16.msra.mxu0 %v1969_v61 }
0x16ac   : > { %2937 = vmatprep.subr.bf16.mxu0 %v3368_v8 }
0x16b0   : > { %v3130_v62 = vpop.eup %3129 }
0x16b1   : > { %v1961_v63 = vmul.f32 %v3130_v62, %v3128_v57  ;;  %v2675_v62 = vld [vmem:[#allocation8 + $0x1] ss:$0 sm:$0xff] }
0x16b3   : > { %v1962_v2 = vpack.c.bf16 %v1961_v63, %v1961_v63 }
0x16b5   : > { %2928 = vmatmul.mubr.msk.bf16.vlgmr.msra.gmra.mrb[40].mxu0 %vm638_vm2, %v1962_v2 }
0x16b6   : > { %2938 = vmatpush3.bf16.xpose.msra.mxu0 %v2069_v3  ;;  %2939 = vmatprep.mubr.msk.bf16.mxu0 %vm3369_vm1, %v3368_v8  ;;  %v3089_v3 = vld [vmem:[%s4167_s22 + $0x20] sm:$0xff]  }
0x16b7   : > { %2949 = vmatprep.subr.bf16.mxu0 %v3368_v8 }
0x16bd   : > { %2940 = vmatmul.mubr.msk.bf16.vlgmr.msra.gmra.mrb[44].mxu0 %vm638_vm2, %v2062_v4  ;;  %v3090_v4 = vld [vmem:[%s4167_s22 + $0x28] sm:$0xff]  }
0x16be   : > { %2951 = vmatprep.mubr.msk.bf16.mxu0 %vm3369_vm1, %v3368_v8  ;;  %2950 = vmatpush3.bf16.msra.mxu0 %v2178_v34 }
0x16bf   : > { %2963 = vmatprep.subr.bf16.mxu0 %v3368_v8 }
0x1788   : > { %v2005_v7 = vpop.f32.mrb[40].mxu0 }
0x1789   : > { %v2011_v9 = vpack.c.bf16 %v2005_v7, %v2005_v7  ;;  %v2929_v10 = vpop.f32.mrb[41].mxu0  ;;  %v2680_v7 = vld [vmem:[#allocation10 + $0x1] ss:$0 sm:$0xff] }
0x178a   : > { %v2008_v11 = vpop.f32.mrb[42].mxu0 }
0x178b   : > { %v2930_v21 = vpop.f32.mrb[43].mxu0  ;;  %2934 = vmatmul.mubr.msk.bf16.vlgmr.msra.gmra.mrb[52].mxu1 %vm638_vm2, %v2011_v9 }
0x178c   : > { %2945 = vmatprep.mubr.msk.bf16.mxu1 %vm3369_vm1, %v3368_v8 }
0x1790   : > { %v2105_v12 = vpop.f32.mrb[44].mxu0 }
0x1791   : > { %v2941_v13 = vpop.f32.mrb[45].mxu0  ;;  %v2111_v14 = vsel %vm638_vm2, %v2105_v12, -inf }
0x1792   : > { %2112 = vmax.xlane.f32.xlu0 %v2111_v14  ;;  %v2108_v15 = vpop.f32.mrb[46].mxu0 }
0x1793   : > { %v2942_v16 = vpop.f32.mrb[47].mxu0 }
0x17a8   : > { %2123 = vrot.lane.b32.xlu0 %v3904_v43, %s4175_s28 }
0x181f   : > { %v2113_v17 = vpop.xlane.xlu0 %2112 }
0x1820   : > { %v2114_v18 = vsub.f32 %v2105_v12, %v2113_v17 }
0x1822   : > { %v2115_v19 = vmul.f32 1.442695, %v2114_v18 }
0x1823   : > { %v2124_v20 = vpop.permute.xlu0 %2123 }
0x1824   : > { %3131 = vpow2.f32 %v2115_v19  ;;  %v2129_v22 = vsel %vm702_vm3, %v2124_v20, 0 }
0x1825   : > { %2944 = vmatpush3.bf16.msra.mxu1 %v2129_v22 }
0x1826   : > { %2955 = vmatprep.subr.bf16.mxu1 %v3368_v8 }
0x182e   : > { %v3132_v24 = vpop.eup %3131 }
0x182f   : > { %v2117_v25 = vsel %vm638_vm2, %v3132_v24, 0.0 }
0x1830   : > { %2118 = vadd.xlane.f32.xlu1 %v2117_v25 }
0x185e   : > { %v2054_v27 = vpop.f32.mrb[52].mxu1 }
0x185f   : > { %v2060_v28 = vadd.f32 %v2054_v27, %v3966_v45  ;;  %v2935_v29 = vpop.f32.mrb[53].mxu1 }
0x1860   : > { %v2057_v30 = vpop.f32.mrb[54].mxu1 }
0x1861   : > { %v2936_v43 = vpop.f32.mrb[55].mxu1 }
0x18bd   : > { %v2119_v31 = vpop.xlane.xlu1 %2118 }
0x18be   : > { %3133 = vrcp.f32 %v2119_v31 }
0x18c8   : > { %v3134_v26 = vpop.eup %3133 }
0x18c9   : > { %v2121_v32 = vmul.f32 %v3134_v26, %v3132_v24 }
0x18cb   : > { %v2122_v33 = vpack.c.bf16 %v2121_v32, %v2121_v32 }
0x18cd   : > { %2946 = vmatmul.mubr.msk.bf16.vlgmr.msra.gmra.mrb[56].mxu1 %vm638_vm2, %v2122_v33 }
0x18ce   : > { %2959 = vmatprep.mubr.msk.bf16.mxu1 %vm3369_vm1, %v3368_v8  ;;  %2956 = vmatpush3.bf16.msra.mxu1 %v3087_v55 }
0x18cf   : > { %2957 = vmatprep.subr.bf16.mxu1 %v3368_v8 }
0x19a0   : > { %v2165_v35 = vpop.f32.mrb[56].mxu1 }
0x19a1   : > { %v2171_v36 = vpack.c.bf16 %v2165_v35, %v2165_v35  ;;  %v2947_v37 = vpop.f32.mrb[57].mxu1 }
0x19a2   : > { %v2168_v38 = vpop.f32.mrb[58].mxu1 }
0x19a3   : > { %v2948_v39 = vpop.f32.mrb[59].mxu1  ;;  %2952 = vmatmul.mubr.msk.bf16.vlgmr.msra.gmra.mrb[48].mxu0 %vm638_vm2, %v2171_v36 }
0x19a4   : > { %2971 = vmatprep.mubr.msk.bf16.mxu0 %vm3369_vm1, %v3368_v8  ;;  %2964 = vmatpush3.bf16.msra.mxu0 %v3089_v3  ;;  %v2698_v39 = vld [vmem:[%s4168_s18 + $0x1] ss:$0 sm:$0xff] }
0x19a5   : > { %2965 = vmatprep.subr.bf16.mxu0 %v3368_v8 }
0x19a8   : > { %2966 = vmatpush3.bf16.msra.mxu0 %v3090_v4 }
0x19a9   : > { %2967 = vmatprep.subr.bf16.mxu0 %v3368_v8 }
0x19ac   : > { %2968 = vmatpush3.bf16.msra.mxu0 %v3091_v5 }
0x19ad   : > { %2969 = vmatprep.subr.bf16.mxu0 %v3368_v8 }
0x19b0   : > { %2970 = vmatpush3.bf16.msra.mxu0 %v3092_v6 }
0x1a76   : > { %v2214_v40 = vpop.f32.mrb[48].mxu0 }
0x1a77   : > { %v2220_v41 = vadd.f32 %v2214_v40, %v2060_v28  ;;  %v2953_v42 = vpop.f32.mrb[49].mxu0 }
0x1a78   : > { %v2217_v45 = vpop.f32.mrb[50].mxu0 }
0x1a79   : > { %v2221_v46 = vadd.f32 %v2220_v41, %v3881_v23  ;;  %v2954_v47 = vpop.f32.mrb[51].mxu0  ;;  %v3088_v23 = vld [vmem:[%s4166_s12 + $0x18] sm:$0xff]  }
0x1a7a   : > { %2958 = vmatpush3.bf16.msra.mxu1 %v3088_v23  ;;  %v2699_v23 = vld [vmem:[%s4176_s14] ss:$0 sm:$0xff]  ;;  %s3289_s14 = sshll.u32 %s3381_s19, 4  ;;  %s3290_s14 = int_to_ptr.vmem [resolvable:$false] %s3289_s14 }
0x1a7b   : > { %v4013_v48 = vadd.f32 %v2673_v44, %v2221_v46  ;;  %s3291_s28 = scalar_lea.vmem %s3290_s14, 256  ;;  %p3292_p12 = scmp.lt.s32.totalorder %s4063_s10, %s3290_s14 }
0x1a7c   : > { %p3293_p3 = scmp.lt.s32.totalorder %s3291_s28, %s3285_s24 }
0x1a7d   : > { %v2235_v49 = vsel %vm545_vm0, %v4013_v48, 0.0 }
0x1a7e   : > { %2236 = vadd.xlane.f32.xlu1 %v2235_v49  ;;  %p3294_p13 = por %p3293_p3, %p3292_p12 }
0x1a80   : > { %p3295_p0 = pnand %p3294_p13, %p3288_p9 }
0x1b0b   : > { %v2237_v50 = vpop.xlane.xlu1 %2236 }
0x1b0c   : > { %v2238_v51 = vmul.f32 0.03125, %v2237_v50 }
0x1b0e   : > { %v2239_v52 = vsub.f32 %v4013_v48, %v2238_v51 }
0x1b10   : > { %v2240_v53 = vmul.f32 %v2239_v52, %v2239_v52 }
0x1b12   : > { %v2241_v54 = vsel %vm545_vm0, %v2240_v53, 0.0 }
0x1b13   : > { %2242 = vadd.xlane.f32.xlu1 %v2241_v54 }
0x1ba0   : > { %v2243_v56 = vpop.xlane.xlu1 %2242 }
0x1ba1   : > { %v2244_v57 = vmul.f32 0.03125, %v2243_v56 }
0x1ba3   : > { %v2245_v58 = vadd.f32 1e-05, %v2244_v57  ;;  %v2700_v57 = vld [vmem:[%s4177_s13] ss:$0 sm:$0xff] }
0x1ba5   : > { %3135 = vrsqrt.f32 %v2245_v58 }
0x1baf   : > { %v3136_v59 = vpop.eup %3135 }
0x1bb0   : > { %v2247_v61 = vmul.f32 %v3136_v59, %v2239_v52 }
0x1bb2   : > { %v2254_v63 = vmul.f32 %v2674_v60, %v2247_v61 }
0x1bb4   : > { %v2261_v1 = vadd.f32 %v2675_v62, %v2254_v63 }
0x1bb6   : > { %v2262_v2 = vpack.c.bf16 %v2261_v1, %v2261_v1 }
0x1bb8   : > { %2960 = vmatmul.mubr.msk.bf16.vlgmr.msra.gmra.mrb[60].mxu1 %vm545_vm0, %v2262_v2 }
0x1c8b   : > { %v2325_v9 = vpop.f32.mrb[60].mxu1 }
0x1c8c   : > { %v2326_v10 = vadd.f32 %v2680_v7, %v2325_v9  ;;  %v2961_v11 = vpop.f32.mrb[61].mxu1 }
0x1c8d   : > { %v2328_v21 = vpop.f32.mrb[62].mxu1 }
0x1c8e   : > { %v2332_v12 = vmul.f32 0.70710677, %v2326_v10  ;;  %v2962_v13 = vpop.f32.mrb[63].mxu1  ;;  %v2331_v34 = vmul.f32 0.5, %v2326_v10 }
0x1c90   : > { %v2333_v14 = vand.u32 2147483647, %v2332_v12  ;;  %vm2353_vm6 = vcmp.lt.f32.partialorder %v2332_v12, 0.0 }
0x1c92   : > { %v2334_v15 = vmul.f32 0.3275911, %v2333_v14  ;;  %v2347_v17 = vsub.f32 0.0, %v2333_v14 }
0x1c94   : > { %v2335_v16 = vadd.f32 1.0, %v2334_v15  ;;  %v2348_v19 = vmul.f32 %v2347_v17, %v2333_v14 }
0x1c96   : > { %3137 = vrcp.f32 %v2335_v16  ;;  %v2349_v22 = vmul.f32 1.442695, %v2348_v19 }
0x1c98   : > { %3139 = vpow2.f32 %v2349_v22 }
0x1ca0   : > { %v3138_v18 = vpop.eup %3137 }
0x1ca1   : > { %v2338_v8 = vmul.f32 1.0614054, %v3138_v18 }
0x1ca2   : > { %v3140_v31 = vpop.eup %3139 }
0x1ca3   : > { %v2339_v20 = vadd.f32 -1.4531521, %v2338_v8 }
0x1ca5   : > { %v2340_v24 = vmul.f32 %v3138_v18, %v2339_v20 }
0x1ca7   : > { %v2341_v25 = vadd.f32 1.4214138, %v2340_v24 }
0x1ca9   : > { %v2342_v27 = vmul.f32 %v3138_v18, %v2341_v25 }
0x1cab   : > { %v2343_v28 = vadd.f32 -0.28449672, %v2342_v27 }
0x1cad   : > { %v2344_v29 = vmul.f32 %v3138_v18, %v2343_v28 }
0x1caf   : > { %v2345_v30 = vadd.f32 0.2548296, %v2344_v29 }
0x1cb1   : > { %v2346_v43 = vmul.f32 %v3138_v18, %v2345_v30 }
0x1cb3   : > { %v2351_v26 = vmul.f32 %v3140_v31, %v2346_v43 }
0x1cb5   : > { %v2352_v32 = vsub.f32 1.0, %v2351_v26 }
0x1cb7   : > { %v2354_v33 = vsub.f32 0.0, %v2352_v32 }
0x1cb9   : > { %v2355_v0 = vsel %vm2353_vm6, %v2354_v33, %v2352_v32 }
0x1cba   : > { %v2356_v35 = vadd.f32 1.0, %v2355_v0 }
0x1cbc   : > { %v2357_v36 = vmul.f32 %v2356_v35, %v2331_v34 }
0x1cbe   : > { %v2358_v37 = vpack.c.bf16 %v2357_v36, %v2357_v36 }
0x1cc0   : > { %2972 = vmatmul.mubr.msk.bf16.vlgmr.msra.gmra.mrb[52].mxu0 %vm1438_vm5, %v2358_v37 }
0x1d93   : > { %v2429_v38 = vpop.f32.mrb[52].mxu0 }
0x1d94   : > { %v2435_v40 = vadd.f32 %v2429_v38, %v4013_v48  ;;  %v2973_v41 = vpop.f32.mrb[53].mxu0 }
0x1d95   : > { %v2432_v42 = vpop.f32.mrb[54].mxu0 }
0x1d96   : > { %v2974_v44 = vpop.f32.mrb[55].mxu0  ;;  %v2444_v45 = vadd.f32 %v2698_v39, %v2435_v40 }
0x1d98   : > { %v2447_v46 = vsel %vm545_vm0, %v2444_v45, 0.0 }
0x1d99   : > { %2448 = vadd.xlane.f32.xlu1 %v2447_v46 }
0x1e26   : > { %v2449_v47 = vpop.xlane.xlu1 %2448 }
0x1e27   : > { %v2450_v49 = vmul.f32 0.03125, %v2449_v47 }
0x1e29   : > { %v2451_v50 = vsub.f32 %v2444_v45, %v2450_v49 }
0x1e2b   : > { %v2452_v51 = vmul.f32 %v2451_v50, %v2451_v50 }
0x1e2d   : > { %v2453_v52 = vsel %vm545_vm0, %v2452_v51, 0.0 }
0x1e2e   : > { %2454 = vadd.xlane.f32.xlu1 %v2453_v52 }
0x1ebb   : > { %v2455_v53 = vpop.xlane.xlu1 %2454 }
0x1ebc   : > { %v2456_v54 = vmul.f32 0.03125, %v2455_v53 }
0x1ebe   : > { %v2457_v48 = vadd.f32 1e-05, %v2456_v54 }
0x1ec0   : > { %3141 = vrsqrt.f32 %v2457_v48 }
0x1eca   : > { %v3142_v55 = vpop.eup %3141 }
0x1ecb   : > { %v2459_v56 = vmul.f32 %v3142_v55, %v2451_v50 }
0x1ecd   : > { %v2466_v58 = vmul.f32 %v2699_v23, %v2459_v56 }
0x1ecf   : > { %v2473_v59 = vadd.f32 %v2700_v57, %v2466_v58 }
0x1ed1   : > { %2474 = vst.msk [vmem:[%s540_s26] sm:$0xff] %vm545_vm0, %v2473_v59 }
0x1ed2   : > { %3298 = shalt.err (!%p3295_p0)
}
0x1ed3   : > { %s3299_s0 = scalar_lea.hbm %s4061_s3, 128  ;;  %s3303_s25 = scalar_lea.hbm %s4179_s2, 256 }
0x1ed4   : > { %p3300_p2 = scmp.ne.s32.totalorder %s4061_s3, %s3299_s0  ;;  %p3304_p10 = scmp.lt.u32.totalorder %s4061_s3, %s4179_s2 }
0x1ed5   : > { %p3305_p11 = scmp.lt.u32.totalorder %s3303_s25, %s3299_s0  ;;  %p3307_p6 = scmp.lt.u32.totalorder %s3299_s0, %s4061_s3 }
0x1ed6   : > { %p3301_p8 = pnand %p3300_p2, %p4180_p5 }
0x1ed7   : > { %p3306_p1 = por %p3305_p11, %p3304_p10 }
0x1ed8   : > { %p3302_p4 = pneg %p3301_p8 }
0x1ed9   : > { %p3308_p7 = por %p3307_p6, %p3306_p1 }
0x1edb   : > { %p3309_p9 = pnand %p3308_p7, %p3302_p4 }
0x1edd   : > { %3312 = shalt.err (!%p3309_p9)
}
0x1ede   : > { %2993 = dma.vmem_to_hbm [thread:$0]  (%p4180_p5), %s4063_s10, 128, %s4061_s3, %s2476_s23  }
0x1edf PF: > { %s2501_s20 = sand.u32 1, %s3347_s29   ;;  %p4181_p12 = scmp.ne.s32.totalorder %s4155_s17, 0 }
0x1ee0   : > { %p4182_p3 = scmp.ge.s32.totalorder %s3359_s16, 2  ;;  %s2502_s26 = scalar_lea.sflag [#allocation4], %s2501_s20 }
0x1ee2   : > { %p3013_p13 = pnand %p4182_p3, %p4181_p12 }
0x1ee4   : > { %3342 = dma.done.wait (!%p3013_p13), %s2502_s26, 128  }
0x1ee5   : > { %3344 = vsyncadd (!%p3013_p13), %s2502_s26, 4294967168  ;;  %p29_p0 = scmp.ge.s32.totalorder %s3609_s21, 4   ;;  %s4183_s29 = smov %s3351_s30 }
0x1ee6   : > { %s4184_s30 = smov %s3355_s15  ;;  %s4185_s15 = smov %s3620_s27 }
0x1ee7   : > { %s4186_s16 = smov %s3609_s21  ;;  %31 = sbr.rel (!%p29_p0) target bundleno = 19 (0x13), region = 154 }
0x1eee   :  { %2507 = vsyncpa [#allocation3], 1 }
0x1eef   :  { %2509 = vsyncpa [#allocation3 + $0x1], 1 }
0x1ef0   :  { %2510 = vsyncpa [#allocation6], 1 }
0x1ef1   :  { %2511 = vsyncpa [#allocation9], 1 }
0x1ef2   :  { %2512 = vsyncpa [#allocation4], 1 }
0x1ef3   :  { %2514 = vsyncpa [#allocation4 + $0x1], 1 }

</bundles_post_ra>
